<compile_context>
chip_gen: v5e
topology: v5e:2x2
jax: 0.10.0
libtpu: 0.0.40
codegen_flags: <defaults>
</compile_context>

<pallas_src>
import functools
import math

import jax
import jax.numpy as jnp
from jax.experimental import pallas as pl
from jax.experimental.pallas import tpu as pltpu

LN_EPS = 1e-12          # HF RoBERTa layer_norm_eps
LOGITS_PAD = 128        # pad classifier output to a full lane width


def _vmem_limit_bytes():
    """Generation-aware VMEM limit: leave ~1/8 of physical VMEM as headroom."""
    cap = 128 * 1024 * 1024
    try:
        info = pltpu.get_tpu_info()
        cap = int(getattr(info, "vmem_capacity_bytes", cap))
    except Exception:
        pass
    return max(32 * 1024 * 1024, min(cap - cap // 8, 112 * 1024 * 1024))


# ----------------------------- in-kernel helpers -----------------------------

def _layer_norm_f32(x, gamma, beta):
    mu = jnp.mean(x, axis=-1, keepdims=True)
    var = jnp.mean((x - mu) ** 2, axis=-1, keepdims=True)
    return (x - mu) * jax.lax.rsqrt(var + LN_EPS) * gamma + beta


def _gelu(x):
    # TODO(synk): HF RoBERTa uses exact erf-GELU; tanh approximation kept for a
    #             guaranteed EUP-friendly Mosaic lowering (tiny numeric drift).
    c = math.sqrt(2.0 / math.pi)
    return 0.5 * x * (1.0 + jnp.tanh(c * (x + 0.044715 * x * x * x)))


def _encoder_block(x_f32, neg_mask, wqkv, bqkv, wo, bo, ln1g, ln1b,
                   w1, b1, w2, b2, ln2g, ln2b, *, num_heads, head_dim):
    """One RoBERTa encoder layer on an (S, H) f32 tile. Returns f32 (S, H)."""
    S, H = x_f32.shape
    x_bf = x_f32.astype(jnp.bfloat16)

    # Fused QKV projection: one MXU call with N = 3H (bf16 in, f32 accum).
    qkv = jnp.dot(x_bf, wqkv, preferred_element_type=jnp.float32) + bqkv   # (S, 3H)
    # Head split is a pure reshape (lane-slice + reshape), no transpose.
    q = qkv[:, 0 * H:1 * H].reshape(S, num_heads, head_dim)
    k = qkv[:, 1 * H:2 * H].reshape(S, num_heads, head_dim)
    v = qkv[:, 2 * H:3 * H].reshape(S, num_heads, head_dim)

    # Batched-head attention; scores / softmax / mask add stay f32.
    scale = 1.0 / math.sqrt(head_dim)
    s = jnp.einsum('qnd,knd->nqk', q.astype(jnp.bfloat16), k.astype(jnp.bfloat16),
                   preferred_element_type=jnp.float32) * scale
    s = s + neg_mask[None, :, :]                          # (nh, Sq, Sk)
    s = s - jnp.max(s, axis=-1, keepdims=True)
    p = jnp.exp(s)
    p = p * pl.reciprocal(jnp.sum(p, axis=-1, keepdims=True), approx=True)

    # Context comes out directly in (S, nh, hd) order -> reshape, no transpose.
    ctx = jnp.einsum('nqk,knd->qnd', p.astype(jnp.bfloat16), v.astype(jnp.bfloat16),
                     preferred_element_type=jnp.float32).reshape(S, H)

    attn = jnp.dot(ctx.astype(jnp.bfloat16), wo,
                   preferred_element_type=jnp.float32) + bo
    h1 = _layer_norm_f32(x_f32 + attn, ln1g, ln1b)

    ff = _gelu(jnp.dot(h1.astype(jnp.bfloat16), w1,
                       preferred_element_type=jnp.float32) + b1)
    ff = jnp.dot(ff.astype(jnp.bfloat16), w2,
                 preferred_element_type=jnp.float32) + b2
    return _layer_norm_f32(h1 + ff, ln2g, ln2b)


# --------------------------------- kernel ------------------------------------

def encoder_stack_kernel(x_ref, mask_ref,
                         wqkv_ref, bqkv_ref, wo_ref, bo_ref,
                         ln1g_ref, ln1b_ref, w1_ref, b1_ref, w2_ref, b2_ref,
                         ln2g_ref, ln2b_ref,
                         wp_ref, bp_ref, wc_ref, bc_ref,
                         pooled_ref, logits_ref,
                         resid_ref,
                         *, num_heads, head_dim):
    """grid=(B, L): full encoder stack + pooler + classifier for one batch row.

    The residual stream lives in an f32 VMEM scratch across the L (arbitrary)
    axis; the embeddings tile x_ref is only consumed at l == 0.
    """
    l = pl.program_id(1)

    @pl.when(l == 0)
    def _():
        resid_ref[...] = x_ref[0].astype(jnp.float32)

    neg = (1.0 - mask_ref[0]) * -1e9                      # (1, S) f32, hoisted
    out = _encoder_block(resid_ref[...], neg,
                         wqkv_ref[0], bqkv_ref[0], wo_ref[0], bo_ref[0],
                         ln1g_ref[0], ln1b_ref[0],
                         w1_ref[0], b1_ref[0], w2_ref[0], b2_ref[0],
                         ln2g_ref[0], ln2b_ref[0],
                         num_heads=num_heads, head_dim=head_dim)
    resid_ref[...] = out

    # Last encoder layer fused with pooler (tanh on CLS) + dropout(eval=id)
    # + classifier.
    @pl.when(l == pl.num_programs(1) - 1)
    def _():
        cls = out[0:1, :]                                  # (1, H) f32, CLS token
        pooled = jnp.tanh(jnp.dot(cls.astype(jnp.bfloat16), wp_ref[...],
                                  preferred_element_type=jnp.float32)
                          + bp_ref[...])
        logits = jnp.dot(pooled.astype(jnp.bfloat16), wc_ref[...],
                         preferred_element_type=jnp.float32) + bc_ref[...]
        pooled_ref[0] = pooled
        logits_ref[0] = logits


# -------------------------------- wrapper ------------------------------------

def chembert_encoder_pallas(x, mask3, layers, head, num_heads, head_dim):
    """Run the fused encoder stack + pooler + classifier in one pallas_call."""
    B, S, H = x.shape
    L = layers["wqkv"].shape[0]
    I = layers["w1"].shape[2]
    CP = head["cls_w"].shape[1]                            # padded class dim

    def layer_spec(shape):
        # Per-layer stacked weights: index varies along l -> keep the default
        # double-buffer so layer l+1 weights prefetch while layer l computes.
        n = len(shape)
        return pl.BlockSpec((1,) + shape, lambda b, l: (l,) + (0,) * n)

    def const_spec(shape):
        # Grid-invariant weights (pooler/classifier): single-buffer, nothing
        # to overlap and double-buffering would only double VMEM residency.
        n = len(shape)
        return pl.BlockSpec(shape, lambda b, l: (0,) * n,
                            pipeline_mode=pl.Buffered(1))

    in_specs = [
        pl.BlockSpec((1, S, H), lambda b, l: (b, 0, 0)),   # x (f32), const over l
        pl.BlockSpec((1, 1, S), lambda b, l: (b, 0, 0)),   # mask (f32)
        layer_spec((H, 3 * H)), layer_spec((1, 3 * H)),    # Wqkv (bf16), bqkv
        layer_spec((H, H)), layer_spec((1, H)),            # Wo, bo
        layer_spec((1, H)), layer_spec((1, H)),            # ln1 gamma/beta
        layer_spec((H, I)), layer_spec((1, I)),            # W1, b1
        layer_spec((I, H)), layer_spec((1, H)),            # W2, b2
        layer_spec((1, H)), layer_spec((1, H)),            # ln2 gamma/beta
        const_spec((H, H)), const_spec((1, H)),            # pooler W/b
        const_spec((H, CP)), const_spec((1, CP)),          # classifier W/b (padded)
    ]
    out_specs = (pl.BlockSpec((1, 1, H), lambda b, l: (b, 0, 0)),
                 pl.BlockSpec((1, 1, CP), lambda b, l: (b, 0, 0)))

    kernel = functools.partial(encoder_stack_kernel,
                               num_heads=num_heads, head_dim=head_dim)
    # TODO(synk): for v7x online inference with B == 1, add a second "parallel"
    #             axis over query tiles so both TensorCores have work.
    pooled, logits = pl.pallas_call(
        kernel,
        out_shape=(jax.ShapeDtypeStruct((B, 1, H), jnp.float32),
                   jax.ShapeDtypeStruct((B, 1, CP), jnp.float32)),
        grid=(B, L),
        in_specs=in_specs,
        out_specs=out_specs,
        scratch_shapes=[pltpu.VMEM((S, H), jnp.float32)],   # f32 residual carry
        compiler_params=pltpu.CompilerParams(
            dimension_semantics=("parallel", "arbitrary"),
            vmem_limit_bytes=_vmem_limit_bytes()),
    )(x, mask3,
      layers["wqkv"], layers["bqkv"], layers["wo"], layers["bo"],
      layers["ln1_g"], layers["ln1_b"],
      layers["w1"], layers["b1"], layers["w2"], layers["b2"],
      layers["ln2_g"], layers["ln2_b"],
      head["pooler_w"], head["pooler_b"], head["cls_w"], head["cls_b"])
    return pooled[:, 0, :], logits[:, 0, :]


# --------------------------- params + full forward ----------------------------

def init_params(key, *, vocab, max_pos, hidden, inter, num_layers, num_classes,
                num_classes_padded=LOGITS_PAD):
    H, I, L, C = hidden, inter, num_layers, num_classes
    CP = max(num_classes_padded, C)
    ks = jax.random.split(key, 9)

    def w_bf16(k, shape):   # matmul weights stored in bf16
        return (0.02 * jax.random.normal(k, shape, jnp.float32)).astype(jnp.bfloat16)

    def w_f32(k, shape):    # embeddings kept f32 (gather + LN run in plain JAX)
        return 0.02 * jax.random.normal(k, shape, jnp.float32)

    ones = lambda *s: jnp.ones(s, jnp.float32)
    zeros = lambda *s: jnp.zeros(s, jnp.float32)

    # Classifier weight padded to a 128-wide lane dim (extra columns are zero).
    cls_w = jnp.zeros((H, CP), jnp.float32)
    cls_w = cls_w.at[:, :C].set(0.02 * jax.random.normal(ks[4], (H, C), jnp.float32))

    return {
        "word_emb": w_f32(ks[0], (vocab, H)),
        "pos_emb": w_f32(ks[1], (max_pos, H)),
        "type_emb": w_f32(ks[2], (2, H)),
        "emb_ln_g": ones(1, H), "emb_ln_b": zeros(1, H),
        "pooler_w": w_bf16(ks[3], (H, H)), "pooler_b": zeros(1, H),
        "cls_w": cls_w.astype(jnp.bfloat16), "cls_b": zeros(1, CP),
        # Per-layer weights stacked along a leading L axis for the fused kernel.
        "layers": {
            "wqkv": w_bf16(ks[5], (L, H, 3 * H)), "bqkv": zeros(L, 1, 3 * H),
            "wo": w_bf16(ks[6], (L, H, H)), "bo": zeros(L, 1, H),
            "ln1_g": ones(L, 1, H), "ln1_b": zeros(L, 1, H),
            "w1": w_bf16(ks[7], (L, H, I)), "b1": zeros(L, 1, I),
            "w2": w_bf16(ks[8], (L, I, H)), "b2": zeros(L, 1, H),
            "ln2_g": ones(L, 1, H), "ln2_b": zeros(L, 1, H),
        },
    }


def chembert_forward(params, input_ids, attention_mask,
                     num_heads, head_dim, token_type_ids=None,
                     num_classes=2, return_features=False):
    B, S = input_ids.shape
    if token_type_ids is None:
        token_type_ids = jnp.zeros_like(input_ids)
    if attention_mask is None:
        attention_mask = jnp.ones_like(input_ids)

    # Embedding gathers are data-dependent lookups -> plain-JAX glue; the
    # embedding LayerNorm is fused here too (XLA fuses gather+add+LN).
    # TODO(synk): RoBERTa offsets position ids by padding_idx+1; irrelevant for
    #             synthetic weights, so plain arange is used.
    x = (params["word_emb"][input_ids]
         + params["pos_emb"][jnp.arange(S)][None, :, :]
         + params["type_emb"][token_type_ids])
    x = _layer_norm_f32(x, params["emb_ln_g"], params["emb_ln_b"])   # f32 (B,S,H)

    mask3 = attention_mask.astype(jnp.float32)[:, None, :]           # (B, 1, S)

    head = {"pooler_w": params["pooler_w"], "pooler_b": params["pooler_b"],
            "cls_w": params["cls_w"], "cls_b": params["cls_b"]}
    pooled, logits_pad = chembert_encoder_pallas(x, mask3, params["layers"],
                                                 head, num_heads, head_dim)
    if return_features:
        return pooled                     # module's return_features=True branch
    return logits_pad[:, :num_classes]    # dropout(p=0.4) is identity at eval


# ----------------------------------- main -------------------------------------

if __name__ == "__main__":
    VOCAB, MAX_POS = 64, 16
    B, S, H = 2, 8, 32
    NUM_HEADS, HEAD_DIM = 2, 16
    INTER, LAYERS, NUM_CLASSES = 64, 2, 2

    root = jax.random.PRNGKey(0)
    k_params, k_ids = jax.random.split(root)
    params = init_params(k_params, vocab=VOCAB, max_pos=MAX_POS, hidden=H,
                         inter=INTER, num_layers=LAYERS, num_classes=NUM_CLASSES)

    input_ids = jax.random.randint(k_ids, (B, S), 0, VOCAB, dtype=jnp.int32)
    attention_mask = jnp.ones((B, S), dtype=jnp.int32).at[1, 6:].set(0)

    logits = chembert_forward(params, input_ids, attention_mask,
                              NUM_HEADS, HEAD_DIM, num_classes=NUM_CLASSES)
    logits = jax.block_until_ready(logits)
    assert logits.shape == (B, NUM_CLASSES) and logits.dtype == jnp.float32
    assert bool(jnp.all(jnp.isfinite(logits)))

    feats = chembert_forward(params, input_ids, attention_mask,
                             NUM_HEADS, HEAD_DIM, num_classes=NUM_CLASSES,
                             return_features=True)
    feats = jax.block_until_ready(feats)
    assert feats.shape == (B, H) and feats.dtype == jnp.float32
    assert bool(jnp.all(jnp.isfinite(feats)))

    print("KERNEL_OK")
</pallas_src>

<mosaic_0001>
module attributes {stable_mosaic.version = 11 : i64} {
  func.func @encoder_stack_kernel(%arg0: i32, %arg1: i32, %arg2: memref<1x8x32xf32, #tpu.memory_space<vmem>>, %arg3: memref<1x1x8xf32, #tpu.memory_space<vmem>>, %arg4: memref<1x32x96xbf16, #tpu.memory_space<vmem>>, %arg5: memref<1x1x96xf32, #tpu.memory_space<vmem>>, %arg6: memref<1x32x32xbf16, #tpu.memory_space<vmem>>, %arg7: memref<1x1x32xf32, #tpu.memory_space<vmem>>, %arg8: memref<1x1x32xf32, #tpu.memory_space<vmem>>, %arg9: memref<1x1x32xf32, #tpu.memory_space<vmem>>, %arg10: memref<1x32x64xbf16, #tpu.memory_space<vmem>>, %arg11: memref<1x1x64xf32, #tpu.memory_space<vmem>>, %arg12: memref<1x64x32xbf16, #tpu.memory_space<vmem>>, %arg13: memref<1x1x32xf32, #tpu.memory_space<vmem>>, %arg14: memref<1x1x32xf32, #tpu.memory_space<vmem>>, %arg15: memref<1x1x32xf32, #tpu.memory_space<vmem>>, %arg16: memref<32x32xbf16, #tpu.memory_space<vmem>>, %arg17: memref<1x32xf32, #tpu.memory_space<vmem>>, %arg18: memref<32x128xbf16, #tpu.memory_space<vmem>>, %arg19: memref<1x128xf32, #tpu.memory_space<vmem>>, %arg20: memref<1x1x32xf32, #tpu.memory_space<vmem>>, %arg21: memref<1x1x128xf32, #tpu.memory_space<vmem>>, %arg22: memref<8x32xf32, #tpu.memory_space<vmem>>) attributes {dimension_semantics = [#tpu.dimension_semantics<parallel>, #tpu.dimension_semantics<arbitrary>], iteration_bounds = array<i64: 2, 2>, scalar_prefetch = 0 : i64, scratch_operands = 1 : i64, tpu.core_type = #tpu.core_type<tc>, window_params = [{transform_indices = @transform_0, window_bounds = array<i64: 1, 8, 32>}, {transform_indices = @transform_1, window_bounds = array<i64: 1, 1, 8>}, {transform_indices = @transform_2, window_bounds = array<i64: 1, 32, 96>}, {transform_indices = @transform_3, window_bounds = array<i64: 1, 1, 96>}, {transform_indices = @transform_4, window_bounds = array<i64: 1, 32, 32>}, {transform_indices = @transform_5, window_bounds = array<i64: 1, 1, 32>}, {transform_indices = @transform_6, window_bounds = array<i64: 1, 1, 32>}, {transform_indices = @transform_7, window_bounds = array<i64: 1, 1, 32>}, {transform_indices = @transform_8, window_bounds = array<i64: 1, 32, 64>}, {transform_indices = @transform_9, window_bounds = array<i64: 1, 1, 64>}, {transform_indices = @transform_10, window_bounds = array<i64: 1, 64, 32>}, {transform_indices = @transform_11, window_bounds = array<i64: 1, 1, 32>}, {transform_indices = @transform_12, window_bounds = array<i64: 1, 1, 32>}, {transform_indices = @transform_13, window_bounds = array<i64: 1, 1, 32>}, {pipeline_mode = #tpu.pipeline_mode<synchronous>, transform_indices = @transform_14, window_bounds = array<i64: 32, 32>}, {pipeline_mode = #tpu.pipeline_mode<synchronous>, transform_indices = @transform_15, window_bounds = array<i64: 1, 32>}, {pipeline_mode = #tpu.pipeline_mode<synchronous>, transform_indices = @transform_16, window_bounds = array<i64: 32, 128>}, {pipeline_mode = #tpu.pipeline_mode<synchronous>, transform_indices = @transform_17, window_bounds = array<i64: 1, 128>}, {transform_indices = @transform_18, window_bounds = array<i64: 1, 1, 32>}, {transform_indices = @transform_19, window_bounds = array<i64: 1, 1, 128>}]} {
    %c0_i32 = arith.constant 0 : i32
    %0 = arith.cmpi eq, %arg1, %c0_i32 : i32
    %1 = arith.extui %0 : i1 to i32
    %c0_i32_0 = arith.constant 0 : i32
    %2 = arith.cmpi ne, %1, %c0_i32_0 : i32
    scf.if %2 {
      %c0_68 = arith.constant 0 : index
      %c0_69 = arith.constant 0 : index
      %c0_70 = arith.constant 0 : index
      %142 = vector.load %arg2[%c0_68, %c0_69, %c0_70] : memref<1x8x32xf32, #tpu.memory_space<vmem>>, vector<1x8x32xf32>
      %143 = vector.shape_cast %142 : vector<1x8x32xf32> to vector<8x32xf32>
      %c0_71 = arith.constant 0 : index
      %c0_72 = arith.constant 0 : index
      %144 = vector.load %arg22[%c0_71, %c0_72] : memref<8x32xf32, #tpu.memory_space<vmem>>, vector<8x32xf32>
      tpu.vector_store %arg22[%c0_71, %c0_72], %143 {strides = array<i32>} : memref<8x32xf32, #tpu.memory_space<vmem>>, vector<8x32xf32>,
    } else {
    }
    %c0 = arith.constant 0 : index
    %c0_1 = arith.constant 0 : index
    %c0_2 = arith.constant 0 : index
    %3 = vector.load %arg3[%c0, %c0_1, %c0_2] : memref<1x1x8xf32, #tpu.memory_space<vmem>>, vector<1x1x8xf32>
    %4 = vector.shape_cast %3 : vector<1x1x8xf32> to vector<1x8xf32>
    %cst = arith.constant 1.000000e+00 : f32
    %5 = vector.broadcast %cst : f32 to vector<1x8xf32>
    %6 = arith.subf %5, %4 : vector<1x8xf32>
    %cst_3 = arith.constant -1.000000e+09 : f32
    %7 = vector.broadcast %cst_3 : f32 to vector<1x8xf32>
    %8 = arith.mulf %6, %7 : vector<1x8xf32>
    %c0_4 = arith.constant 0 : index
    %c0_5 = arith.constant 0 : index
    %9 = vector.load %arg22[%c0_4, %c0_5] : memref<8x32xf32, #tpu.memory_space<vmem>>, vector<8x32xf32>
    %c0_6 = arith.constant 0 : index
    %c0_7 = arith.constant 0 : index
    %c0_8 = arith.constant 0 : index
    %10 = vector.load %arg4[%c0_6, %c0_7, %c0_8] : memref<1x32x96xbf16, #tpu.memory_space<vmem>>, vector<1x32x96xbf16>
    %11 = vector.shape_cast %10 : vector<1x32x96xbf16> to vector<32x96xbf16>
    %c0_9 = arith.constant 0 : index
    %c0_10 = arith.constant 0 : index
    %c0_11 = arith.constant 0 : index
    %12 = vector.load %arg5[%c0_9, %c0_10, %c0_11] : memref<1x1x96xf32, #tpu.memory_space<vmem>>, vector<1x1x96xf32>
    %13 = vector.shape_cast %12 : vector<1x1x96xf32> to vector<1x96xf32>
    %c0_12 = arith.constant 0 : index
    %c0_13 = arith.constant 0 : index
    %c0_14 = arith.constant 0 : index
    %14 = vector.load %arg6[%c0_12, %c0_13, %c0_14] : memref<1x32x32xbf16, #tpu.memory_space<vmem>>, vector<1x32x32xbf16>
    %15 = vector.shape_cast %14 : vector<1x32x32xbf16> to vector<32x32xbf16>
    %c0_15 = arith.constant 0 : index
    %c0_16 = arith.constant 0 : index
    %c0_17 = arith.constant 0 : index
    %16 = vector.load %arg7[%c0_15, %c0_16, %c0_17] : memref<1x1x32xf32, #tpu.memory_space<vmem>>, vector<1x1x32xf32>
    %17 = vector.shape_cast %16 : vector<1x1x32xf32> to vector<1x32xf32>
    %c0_18 = arith.constant 0 : index
    %c0_19 = arith.constant 0 : index
    %c0_20 = arith.constant 0 : index
    %18 = vector.load %arg8[%c0_18, %c0_19, %c0_20] : memref<1x1x32xf32, #tpu.memory_space<vmem>>, vector<1x1x32xf32>
    %19 = vector.shape_cast %18 : vector<1x1x32xf32> to vector<1x32xf32>
    %c0_21 = arith.constant 0 : index
    %c0_22 = arith.constant 0 : index
    %c0_23 = arith.constant 0 : index
    %20 = vector.load %arg9[%c0_21, %c0_22, %c0_23] : memref<1x1x32xf32, #tpu.memory_space<vmem>>, vector<1x1x32xf32>
    %21 = vector.shape_cast %20 : vector<1x1x32xf32> to vector<1x32xf32>
    %c0_24 = arith.constant 0 : index
    %c0_25 = arith.constant 0 : index
    %c0_26 = arith.constant 0 : index
    %22 = vector.load %arg10[%c0_24, %c0_25, %c0_26] : memref<1x32x64xbf16, #tpu.memory_space<vmem>>, vector<1x32x64xbf16>
    %23 = vector.shape_cast %22 : vector<1x32x64xbf16> to vector<32x64xbf16>
    %c0_27 = arith.constant 0 : index
    %c0_28 = arith.constant 0 : index
    %c0_29 = arith.constant 0 : index
    %24 = vector.load %arg11[%c0_27, %c0_28, %c0_29] : memref<1x1x64xf32, #tpu.memory_space<vmem>>, vector<1x1x64xf32>
    %25 = vector.shape_cast %24 : vector<1x1x64xf32> to vector<1x64xf32>
    %c0_30 = arith.constant 0 : index
    %c0_31 = arith.constant 0 : index
    %c0_32 = arith.constant 0 : index
    %26 = vector.load %arg12[%c0_30, %c0_31, %c0_32] : memref<1x64x32xbf16, #tpu.memory_space<vmem>>, vector<1x64x32xbf16>
    %27 = vector.shape_cast %26 : vector<1x64x32xbf16> to vector<64x32xbf16>
    %c0_33 = arith.constant 0 : index
    %c0_34 = arith.constant 0 : index
    %c0_35 = arith.constant 0 : index
    %28 = vector.load %arg13[%c0_33, %c0_34, %c0_35] : memref<1x1x32xf32, #tpu.memory_space<vmem>>, vector<1x1x32xf32>
    %29 = vector.shape_cast %28 : vector<1x1x32xf32> to vector<1x32xf32>
    %c0_36 = arith.constant 0 : index
    %c0_37 = arith.constant 0 : index
    %c0_38 = arith.constant 0 : index
    %30 = vector.load %arg14[%c0_36, %c0_37, %c0_38] : memref<1x1x32xf32, #tpu.memory_space<vmem>>, vector<1x1x32xf32>
    %31 = vector.shape_cast %30 : vector<1x1x32xf32> to vector<1x32xf32>
    %c0_39 = arith.constant 0 : index
    %c0_40 = arith.constant 0 : index
    %c0_41 = arith.constant 0 : index
    %32 = vector.load %arg15[%c0_39, %c0_40, %c0_41] : memref<1x1x32xf32, #tpu.memory_space<vmem>>, vector<1x1x32xf32>
    %33 = vector.shape_cast %32 : vector<1x1x32xf32> to vector<1x32xf32>
    %34 = arith.truncf %9 : vector<8x32xf32> to vector<8x32xbf16>
    %cst_42 = arith.constant dense<0.000000e+00> : vector<8x96xf32>
    %35 = tpu.matmul %34, %11, %cst_42 {dimension_numbers = #tpu.dot_dimension_numbers<[1], [0], [0], [1], [0, 0, 1, 1], [], []>} : vector<8x32xbf16>, vector<32x96xbf16>, vector<8x96xf32> -> vector<8x96xf32>
    %36 = vector.broadcast %13 : vector<1x96xf32> to vector<8x96xf32>
    %37 = arith.addf %35, %36 : vector<8x96xf32>
    %38 = vector.extract_strided_slice %37 {offsets = [0, 0], sizes = [8, 32], strides = [1, 1]} : vector<8x96xf32> to vector<8x32xf32>
    %39 = vector.shape_cast %38 : vector<8x32xf32> to vector<8x2x16xf32>
    %40 = vector.extract_strided_slice %37 {offsets = [0, 32], sizes = [8, 32], strides = [1, 1]} : vector<8x96xf32> to vector<8x32xf32>
    %41 = vector.shape_cast %40 : vector<8x32xf32> to vector<8x2x16xf32>
    %42 = vector.extract_strided_slice %37 {offsets = [0, 64], sizes = [8, 32], strides = [1, 1]} : vector<8x96xf32> to vector<8x32xf32>
    %43 = vector.shape_cast %42 : vector<8x32xf32> to vector<8x2x16xf32>
    %44 = arith.truncf %39 : vector<8x2x16xf32> to vector<8x2x16xbf16>
    %45 = arith.truncf %41 : vector<8x2x16xf32> to vector<8x2x16xbf16>
    "tpu.trace_start"() <{level = 10 : i32, message = "qnd,knd->nqk"}> : () -> ()
    %cst_43 = arith.constant dense<0.000000e+00> : vector<2x8x8xf32>
    %46 = tpu.matmul %44, %45, %cst_43 {dimension_numbers = #tpu.dot_dimension_numbers<[2], [2], [0], [0], [0, 1, 0, 0, 1, 0], [1], [1]>} : vector<8x2x16xbf16>, vector<8x2x16xbf16>, vector<2x8x8xf32> -> vector<2x8x8xf32>
    "tpu.trace_stop"() : () -> ()
    %cst_44 = arith.constant 2.500000e-01 : f32
    %47 = vector.broadcast %cst_44 : f32 to vector<2x8x8xf32>
    %48 = arith.mulf %46, %47 : vector<2x8x8xf32>
    %49 = vector.shape_cast %8 : vector<1x8xf32> to vector<1x1x8xf32>
    %50 = vector.broadcast %49 : vector<1x1x8xf32> to vector<2x8x8xf32>
    %51 = arith.addf %48, %50 : vector<2x8x8xf32>
    %cst_45 = arith.constant dense<0xFF800000> : vector<2x8xf32>
    %52 = vector.multi_reduction <maximumf>, %51, %cst_45 [2] : vector<2x8x8xf32> to vector<2x8xf32>
    %53 = vector.shape_cast %52 : vector<2x8xf32> to vector<2x8x1xf32>
    %54 = vector.broadcast %53 : vector<2x8x1xf32> to vector<2x8x8xf32>
    %55 = arith.subf %51, %54 : vector<2x8x8xf32>
    %56 = math.exp %55 : vector<2x8x8xf32>
    %cst_46 = arith.constant dense<0.000000e+00> : vector<2x8xf32>
    %57 = vector.multi_reduction <add>, %56, %cst_46 [2] : vector<2x8x8xf32> to vector<2x8xf32>
    %58 = vector.shape_cast %57 : vector<2x8xf32> to vector<2x8x1xf32>
    %59 = tpu.reciprocal %58 {approx = true} : vector<2x8x1xf32> -> vector<2x8x1xf32>
    %60 = vector.broadcast %59 : vector<2x8x1xf32> to vector<2x8x8xf32>
    %61 = arith.mulf %56, %60 : vector<2x8x8xf32>
    %62 = arith.truncf %61 : vector<2x8x8xf32> to vector<2x8x8xbf16>
    %63 = arith.truncf %43 : vector<8x2x16xf32> to vector<8x2x16xbf16>
    "tpu.trace_start"() <{level = 10 : i32, message = "nqk,knd->qnd"}> : () -> ()
    %cst_47 = arith.constant dense<0.000000e+00> : vector<2x16x8xf32>
    %64 = tpu.matmul %63, %62, %cst_47 {dimension_numbers = #tpu.dot_dimension_numbers<[0], [2], [2], [1], [0, 1, 0, 2, 1, 1], [1], [0]>} : vector<8x2x16xbf16>, vector<2x8x8xbf16>, vector<2x16x8xf32> -> vector<2x16x8xf32>
    %65 = tpu.transpose %64, [2, 0, 1] : vector<2x16x8xf32> -> vector<8x2x16xf32>
    "tpu.trace_stop"() : () -> ()
    %66 = vector.shape_cast %65 : vector<8x2x16xf32> to vector<8x32xf32>
    %67 = arith.truncf %66 : vector<8x32xf32> to vector<8x32xbf16>
    %cst_48 = arith.constant dense<0.000000e+00> : vector<8x32xf32>
    %68 = tpu.matmul %67, %15, %cst_48 {dimension_numbers = #tpu.dot_dimension_numbers<[1], [0], [0], [1], [0, 0, 1, 1], [], []>} : vector<8x32xbf16>, vector<32x32xbf16>, vector<8x32xf32> -> vector<8x32xf32>
    %69 = vector.broadcast %17 : vector<1x32xf32> to vector<8x32xf32>
    %70 = arith.addf %68, %69 : vector<8x32xf32>
    %71 = arith.addf %9, %70 : vector<8x32xf32>
    %cst_49 = arith.constant dense<0.000000e+00> : vector<8xf32>
    %72 = vector.multi_reduction <add>, %71, %cst_49 [1] : vector<8x32xf32> to vector<8xf32>
    %73 = vector.shape_cast %72 : vector<8xf32> to vector<8x1xf32>
    %cst_50 = arith.constant 3.200000e+01 : f32
    %74 = vector.broadcast %cst_50 : f32 to vector<8x1xf32>
    %75 = arith.divf %73, %74 : vector<8x1xf32>
    %76 = vector.broadcast %75 : vector<8x1xf32> to vector<8x32xf32>
    %77 = arith.subf %71, %76 : vector<8x32xf32>
    %78 = arith.mulf %77, %77 : vector<8x32xf32>
    %cst_51 = arith.constant dense<0.000000e+00> : vector<8xf32>
    %79 = vector.multi_reduction <add>, %78, %cst_51 [1] : vector<8x32xf32> to vector<8xf32>
    %80 = vector.shape_cast %79 : vector<8xf32> to vector<8x1xf32>
    %cst_52 = arith.constant 3.200000e+01 : f32
    %81 = vector.broadcast %cst_52 : f32 to vector<8x1xf32>
    %82 = arith.divf %80, %81 : vector<8x1xf32>
    %83 = vector.broadcast %75 : vector<8x1xf32> to vector<8x32xf32>
    %84 = arith.subf %71, %83 : vector<8x32xf32>
    %cst_53 = arith.constant 9.99999996E-13 : f32
    %85 = vector.broadcast %cst_53 : f32 to vector<8x1xf32>
    %86 = arith.addf %82, %85 : vector<8x1xf32>
    %87 = math.rsqrt %86 : vector<8x1xf32>
    %88 = vector.broadcast %87 : vector<8x1xf32> to vector<8x32xf32>
    %89 = arith.mulf %84, %88 : vector<8x32xf32>
    %90 = vector.broadcast %19 : vector<1x32xf32> to vector<8x32xf32>
    %91 = arith.mulf %89, %90 : vector<8x32xf32>
    %92 = vector.broadcast %21 : vector<1x32xf32> to vector<8x32xf32>
    %93 = arith.addf %91, %92 : vector<8x32xf32>
    %94 = arith.truncf %93 : vector<8x32xf32> to vector<8x32xbf16>
    %cst_54 = arith.constant dense<0.000000e+00> : vector<8x64xf32>
    %95 = tpu.matmul %94, %23, %cst_54 {dimension_numbers = #tpu.dot_dimension_numbers<[1], [0], [0], [1], [0, 0, 1, 1], [], []>} : vector<8x32xbf16>, vector<32x64xbf16>, vector<8x64xf32> -> vector<8x64xf32>
    %96 = vector.broadcast %25 : vector<1x64xf32> to vector<8x64xf32>
    %97 = arith.addf %95, %96 : vector<8x64xf32>
    %cst_55 = arith.constant 5.000000e-01 : f32
    %98 = vector.broadcast %cst_55 : f32 to vector<8x64xf32>
    %99 = arith.mulf %98, %97 : vector<8x64xf32>
    %cst_56 = arith.constant 4.471500e-02 : f32
    %100 = vector.broadcast %cst_56 : f32 to vector<8x64xf32>
    %101 = arith.mulf %100, %97 : vector<8x64xf32>
    %102 = arith.mulf %101, %97 : vector<8x64xf32>
    %103 = arith.mulf %102, %97 : vector<8x64xf32>
    %104 = arith.addf %97, %103 : vector<8x64xf32>
    %cst_57 = arith.constant 0.797884583 : f32
    %105 = vector.broadcast %cst_57 : f32 to vector<8x64xf32>
    %106 = arith.mulf %105, %104 : vector<8x64xf32>
    %107 = math.tanh %106 : vector<8x64xf32>
    %cst_58 = arith.constant 1.000000e+00 : f32
    %108 = vector.broadcast %cst_58 : f32 to vector<8x64xf32>
    %109 = arith.addf %108, %107 : vector<8x64xf32>
    %110 = arith.mulf %99, %109 : vector<8x64xf32>
    %111 = arith.truncf %110 : vector<8x64xf32> to vector<8x64xbf16>
    %cst_59 = arith.constant dense<0.000000e+00> : vector<8x32xf32>
    %112 = tpu.matmul %111, %27, %cst_59 {dimension_numbers = #tpu.dot_dimension_numbers<[1], [0], [0], [1], [0, 0, 1, 1], [], []>} : vector<8x64xbf16>, vector<64x32xbf16>, vector<8x32xf32> -> vector<8x32xf32>
    %113 = vector.broadcast %29 : vector<1x32xf32> to vector<8x32xf32>
    %114 = arith.addf %112, %113 : vector<8x32xf32>
    %115 = arith.addf %93, %114 : vector<8x32xf32>
    %cst_60 = arith.constant dense<0.000000e+00> : vector<8xf32>
    %116 = vector.multi_reduction <add>, %115, %cst_60 [1] : vector<8x32xf32> to vector<8xf32>
    %117 = vector.shape_cast %116 : vector<8xf32> to vector<8x1xf32>
    %cst_61 = arith.constant 3.200000e+01 : f32
    %118 = vector.broadcast %cst_61 : f32 to vector<8x1xf32>
    %119 = arith.divf %117, %118 : vector<8x1xf32>
    %120 = vector.broadcast %119 : vector<8x1xf32> to vector<8x32xf32>
    %121 = arith.subf %115, %120 : vector<8x32xf32>
    %122 = arith.mulf %121, %121 : vector<8x32xf32>
    %cst_62 = arith.constant dense<0.000000e+00> : vector<8xf32>
    %123 = vector.multi_reduction <add>, %122, %cst_62 [1] : vector<8x32xf32> to vector<8xf32>
    %124 = vector.shape_cast %123 : vector<8xf32> to vector<8x1xf32>
    %cst_63 = arith.constant 3.200000e+01 : f32
    %125 = vector.broadcast %cst_63 : f32 to vector<8x1xf32>
    %126 = arith.divf %124, %125 : vector<8x1xf32>
    %127 = vector.broadcast %119 : vector<8x1xf32> to vector<8x32xf32>
    %128 = arith.subf %115, %127 : vector<8x32xf32>
    %cst_64 = arith.constant 9.99999996E-13 : f32
    %129 = vector.broadcast %cst_64 : f32 to vector<8x1xf32>
    %130 = arith.addf %126, %129 : vector<8x1xf32>
    %131 = math.rsqrt %130 : vector<8x1xf32>
    %132 = vector.broadcast %131 : vector<8x1xf32> to vector<8x32xf32>
    %133 = arith.mulf %128, %132 : vector<8x32xf32>
    %134 = vector.broadcast %31 : vector<1x32xf32> to vector<8x32xf32>
    %135 = arith.mulf %133, %134 : vector<8x32xf32>
    %136 = vector.broadcast %33 : vector<1x32xf32> to vector<8x32xf32>
    %137 = arith.addf %135, %136 : vector<8x32xf32>
    %c0_65 = arith.constant 0 : index
    %c0_66 = arith.constant 0 : index
    %138 = vector.load %arg22[%c0_65, %c0_66] : memref<8x32xf32, #tpu.memory_space<vmem>>, vector<8x32xf32>
    tpu.vector_store %arg22[%c0_65, %c0_66], %137 {strides = array<i32>} : memref<8x32xf32, #tpu.memory_space<vmem>>, vector<8x32xf32>,
    %c1_i32 = arith.constant 1 : i32
    %139 = arith.cmpi eq, %arg1, %c1_i32 : i32
    %140 = arith.extui %139 : i1 to i32
    %c0_i32_67 = arith.constant 0 : i32
    %141 = arith.cmpi ne, %140, %c0_i32_67 : i32
    scf.if %141 {
      %142 = vector.extract_strided_slice %137 {offsets = [0, 0], sizes = [1, 32], strides = [1, 1]} : vector<8x32xf32> to vector<1x32xf32>
      %143 = arith.truncf %142 : vector<1x32xf32> to vector<1x32xbf16>
      %c0_68 = arith.constant 0 : index
      %c0_69 = arith.constant 0 : index
      %144 = vector.load %arg16[%c0_68, %c0_69] : memref<32x32xbf16, #tpu.memory_space<vmem>>, vector<32x32xbf16>
      %cst_70 = arith.constant dense<0.000000e+00> : vector<1x32xf32>
      %145 = tpu.matmul %143, %144, %cst_70 {dimension_numbers = #tpu.dot_dimension_numbers<[1], [0], [0], [1], [0, 0, 1, 1], [], []>} : vector<1x32xbf16>, vector<32x32xbf16>, vector<1x32xf32> -> vector<1x32xf32>
      %c0_71 = arith.constant 0 : index
      %c0_72 = arith.constant 0 : index
      %146 = vector.load %arg17[%c0_71, %c0_72] : memref<1x32xf32, #tpu.memory_space<vmem>>, vector<1x32xf32>
      %147 = arith.addf %145, %146 : vector<1x32xf32>
      %148 = math.tanh %147 : vector<1x32xf32>
      %149 = arith.truncf %148 : vector<1x32xf32> to vector<1x32xbf16>
      %c0_73 = arith.constant 0 : index
      %c0_74 = arith.constant 0 : index
      %150 = vector.load %arg18[%c0_73, %c0_74] : memref<32x128xbf16, #tpu.memory_space<vmem>>, vector<32x128xbf16>
      %cst_75 = arith.constant dense<0.000000e+00> : vector<1x128xf32>
      %151 = tpu.matmul %149, %150, %cst_75 {dimension_numbers = #tpu.dot_dimension_numbers<[1], [0], [0], [1], [0, 0, 1, 1], [], []>} : vector<1x32xbf16>, vector<32x128xbf16>, vector<1x128xf32> -> vector<1x128xf32>
      %c0_76 = arith.constant 0 : index
      %c0_77 = arith.constant 0 : index
      %152 = vector.load %arg19[%c0_76, %c0_77] : memref<1x128xf32, #tpu.memory_space<vmem>>, vector<1x128xf32>
      %153 = arith.addf %151, %152 : vector<1x128xf32>
      %c0_78 = arith.constant 0 : index
      %c0_79 = arith.constant 0 : index
      %c0_80 = arith.constant 0 : index
      %154 = vector.load %arg20[%c0_78, %c0_79, %c0_80] : memref<1x1x32xf32, #tpu.memory_space<vmem>>, vector<1x1x32xf32>
      %155 = vector.shape_cast %154 : vector<1x1x32xf32> to vector<1x32xf32>
      %156 = vector.shape_cast %148 : vector<1x32xf32> to vector<1x1x32xf32>
      tpu.vector_store %arg20[%c0_78, %c0_79, %c0_80], %156 {strides = array<i32>} : memref<1x1x32xf32, #tpu.memory_space<vmem>>, vector<1x1x32xf32>,
      %c0_81 = arith.constant 0 : index
      %c0_82 = arith.constant 0 : index
      %c0_83 = arith.constant 0 : index
      %157 = vector.load %arg21[%c0_81, %c0_82, %c0_83] : memref<1x1x128xf32, #tpu.memory_space<vmem>>, vector<1x1x128xf32>
      %158 = vector.shape_cast %157 : vector<1x1x128xf32> to vector<1x128xf32>
      %159 = vector.shape_cast %153 : vector<1x128xf32> to vector<1x1x128xf32>
      tpu.vector_store %arg21[%c0_81, %c0_82, %c0_83], %159 {strides = array<i32>} : memref<1x1x128xf32, #tpu.memory_space<vmem>>, vector<1x1x128xf32>,
    } else {
    }
    return
  }
  func.func @transform_0(%arg0: i32, %arg1: i32) -> (i32, i32, i32) {
    %c0_i32 = arith.constant 0 : i32
    %c0_i32_0 = arith.constant 0 : i32
    %c0_i32_1 = arith.constant 0 : i32
    return %arg0, %c0_i32, %c0_i32_0 : i32, i32, i32
  }
  func.func @transform_1(%arg0: i32, %arg1: i32) -> (i32, i32, i32) {
    %c0_i32 = arith.constant 0 : i32
    %c0_i32_0 = arith.constant 0 : i32
    %c0_i32_1 = arith.constant 0 : i32
    return %arg0, %c0_i32, %c0_i32_0 : i32, i32, i32
  }
  func.func @transform_2(%arg0: i32, %arg1: i32) -> (i32, i32, i32) {
    %c0_i32 = arith.constant 0 : i32
    %c0_i32_0 = arith.constant 0 : i32
    %c0_i32_1 = arith.constant 0 : i32
    return %arg1, %c0_i32, %c0_i32_0 : i32, i32, i32
  }
  func.func @transform_3(%arg0: i32, %arg1: i32) -> (i32, i32, i32) {
    %c0_i32 = arith.constant 0 : i32
    %c0_i32_0 = arith.constant 0 : i32
    %c0_i32_1 = arith.constant 0 : i32
    return %arg1, %c0_i32, %c0_i32_0 : i32, i32, i32
  }
  func.func @transform_4(%arg0: i32, %arg1: i32) -> (i32, i32, i32) {
    %c0_i32 = arith.constant 0 : i32
    %c0_i32_0 = arith.constant 0 : i32
    %c0_i32_1 = arith.constant 0 : i32
    return %arg1, %c0_i32, %c0_i32_0 : i32, i32, i32
  }
  func.func @transform_5(%arg0: i32, %arg1: i32) -> (i32, i32, i32) {
    %c0_i32 = arith.constant 0 : i32
    %c0_i32_0 = arith.constant 0 : i32
    %c0_i32_1 = arith.constant 0 : i32
    return %arg1, %c0_i32, %c0_i32_0 : i32, i32, i32
  }
  func.func @transform_6(%arg0: i32, %arg1: i32) -> (i32, i32, i32) {
    %c0_i32 = arith.constant 0 : i32
    %c0_i32_0 = arith.constant 0 : i32
    %c0_i32_1 = arith.constant 0 : i32
    return %arg1, %c0_i32, %c0_i32_0 : i32, i32, i32
  }
  func.func @transform_7(%arg0: i32, %arg1: i32) -> (i32, i32, i32) {
    %c0_i32 = arith.constant 0 : i32
    %c0_i32_0 = arith.constant 0 : i32
    %c0_i32_1 = arith.constant 0 : i32
    return %arg1, %c0_i32, %c0_i32_0 : i32, i32, i32
  }
  func.func @transform_8(%arg0: i32, %arg1: i32) -> (i32, i32, i32) {
    %c0_i32 = arith.constant 0 : i32
    %c0_i32_0 = arith.constant 0 : i32
    %c0_i32_1 = arith.constant 0 : i32
    return %arg1, %c0_i32, %c0_i32_0 : i32, i32, i32
  }
  func.func @transform_9(%arg0: i32, %arg1: i32) -> (i32, i32, i32) {
    %c0_i32 = arith.constant 0 : i32
    %c0_i32_0 = arith.constant 0 : i32
    %c0_i32_1 = arith.constant 0 : i32
    return %arg1, %c0_i32, %c0_i32_0 : i32, i32, i32
  }
  func.func @transform_10(%arg0: i32, %arg1: i32) -> (i32, i32, i32) {
    %c0_i32 = arith.constant 0 : i32
    %c0_i32_0 = arith.constant 0 : i32
    %c0_i32_1 = arith.constant 0 : i32
    return %arg1, %c0_i32, %c0_i32_0 : i32, i32, i32
  }
  func.func @transform_11(%arg0: i32, %arg1: i32) -> (i32, i32, i32) {
    %c0_i32 = arith.constant 0 : i32
    %c0_i32_0 = arith.constant 0 : i32
    %c0_i32_1 = arith.constant 0 : i32
    return %arg1, %c0_i32, %c0_i32_0 : i32, i32, i32
  }
  func.func @transform_12(%arg0: i32, %arg1: i32) -> (i32, i32, i32) {
    %c0_i32 = arith.constant 0 : i32
    %c0_i32_0 = arith.constant 0 : i32
    %c0_i32_1 = arith.constant 0 : i32
    return %arg1, %c0_i32, %c0_i32_0 : i32, i32, i32
  }
  func.func @transform_13(%arg0: i32, %arg1: i32) -> (i32, i32, i32) {
    %c0_i32 = arith.constant 0 : i32
    %c0_i32_0 = arith.constant 0 : i32
    %c0_i32_1 = arith.constant 0 : i32
    return %arg1, %c0_i32, %c0_i32_0 : i32, i32, i32
  }
  func.func @transform_14(%arg0: i32, %arg1: i32) -> (i32, i32) {
    %c0_i32 = arith.constant 0 : i32
    %c0_i32_0 = arith.constant 0 : i32
    %c0_i32_1 = arith.constant 0 : i32
    return %c0_i32, %c0_i32_0 : i32, i32
  }
  func.func @transform_15(%arg0: i32, %arg1: i32) -> (i32, i32) {
    %c0_i32 = arith.constant 0 : i32
    %c0_i32_0 = arith.constant 0 : i32
    %c0_i32_1 = arith.constant 0 : i32
    return %c0_i32, %c0_i32_0 : i32, i32
  }
  func.func @transform_16(%arg0: i32, %arg1: i32) -> (i32, i32) {
    %c0_i32 = arith.constant 0 : i32
    %c0_i32_0 = arith.constant 0 : i32
    %c0_i32_1 = arith.constant 0 : i32
    return %c0_i32, %c0_i32_0 : i32, i32
  }
  func.func @transform_17(%arg0: i32, %arg1: i32) -> (i32, i32) {
    %c0_i32 = arith.constant 0 : i32
    %c0_i32_0 = arith.constant 0 : i32
    %c0_i32_1 = arith.constant 0 : i32
    return %c0_i32, %c0_i32_0 : i32, i32
  }
  func.func @transform_18(%arg0: i32, %arg1: i32) -> (i32, i32, i32) {
    %c0_i32 = arith.constant 0 : i32
    %c0_i32_0 = arith.constant 0 : i32
    %c0_i32_1 = arith.constant 0 : i32
    return %arg0, %c0_i32, %c0_i32_0 : i32, i32, i32
  }
  func.func @transform_19(%arg0: i32, %arg1: i32) -> (i32, i32, i32) {
    %c0_i32 = arith.constant 0 : i32
    %c0_i32_0 = arith.constant 0 : i32
    %c0_i32_1 = arith.constant 0 : i32
    return %arg0, %c0_i32, %c0_i32_0 : i32, i32, i32
  }
}

</mosaic_0001>

<bundles_post_ra>
// kernel: tpu_custom_call.1
= control target key start
LH: loop header
LB: loop body
LE: loop exit
PB: predicated region body
PF: predicated region fallthrough
CT: control target
= control target key end

     0   :  { %s4939_s0 = inlined_call_operand.hbm [shape: f32[2,8,32], index: 0, kind: input, shape index: {}]   ;;  %s4940_s1 = inlined_call_operand.hbm [shape: f32[2,1,8], index: 1, kind: input, shape index: {}]   ;;  %s4941_s2 = inlined_call_operand.vmem [shape: bf16[2,32,96], index: 2, kind: input, shape index: {}]   ;;  %s4942_s3 = inlined_call_operand.hbm [shape: f32[2,1,96], index: 3, kind: input, shape index: {}]   ;;  %s4943_s4 = inlined_call_operand.vmem [shape: bf16[2,32,32], index: 4, kind: input, shape index: {}]   ;;  %s4944_s5 = inlined_call_operand.vmem [shape: f32[2,1,32], index: 5, kind: input, shape index: {}]   ;;  %s4945_s6 = inlined_call_operand.vmem [shape: f32[2,1,32], index: 6, kind: input, shape index: {}]   ;;  %s4946_s7 = inlined_call_operand.hbm [shape: f32[2,1,32], index: 7, kind: input, shape index: {}]   ;;  %s4947_s8 = inlined_call_operand.vmem [shape: bf16[2,32,64], index: 8, kind: input, shape index: {}]   ;;  %s4948_s9 = inlined_call_operand.vmem [shape: f32[2,1,64], index: 9, kind: input, shape index: {}]   ;;  %s4949_s10 = inlined_call_operand.vmem [shape: bf16[2,64,32], index: 10, kind: input, shape index: {}]   ;;  %s4950_s11 = inlined_call_operand.vmem [shape: f32[2,1,32], index: 11, kind: input, shape index: {}]   ;;  %s4951_s12 = inlined_call_operand.vmem [shape: f32[2,1,32], index: 12, kind: input, shape index: {}]   ;;  %s4952_s13 = inlined_call_operand.hbm [shape: f32[2,1,32], index: 13, kind: input, shape index: {}]   ;;  %s4953_s14 = inlined_call_operand.hbm [shape: bf16[32,32], index: 14, kind: input, shape index: {}]   ;;  %s4954_s15 = inlined_call_operand.vmem [shape: f32[1,32], index: 15, kind: input, shape index: {}]   ;;  %s4955_s16 = inlined_call_operand.hbm [shape: bf16[32,128], index: 16, kind: input, shape index: {}]   ;;  %s4956_s17 = inlined_call_operand.vmem [shape: f32[1,128], index: 17, kind: input, shape index: {}]   ;;  %s4957_s18 = inlined_call_operand.hbm [shape: f32[2,1,32], index: 18, kind: output, shape index: {0}]   ;;  %s4958_s19 = inlined_call_operand.hbm [shape: f32[2,1,128], index: 19, kind: output, shape index: {1}]  }
   0x1   :  { %4980 = sst [smem:[#allocation39_spill]] %s4939_s0 }
   0x2   :  { %4981 = sst [smem:[#allocation40_spill]] %s4940_s1 }
   0x3   :  { %4982 = sst [smem:[#allocation41_spill]] %s4941_s2 }
   0x4   :  { %4983 = sst [smem:[#allocation42_spill]] %s4942_s3 }
   0x5   :  { %4984 = sst [smem:[#allocation43_spill]] %s4943_s4 }
   0x6   :  { %4985 = sst [smem:[#allocation44_spill]] %s4944_s5 }
   0x7   :  { %4986 = sst [smem:[#allocation45_spill]] %s4945_s6 }
   0x8   :  { %4987 = sst [smem:[#allocation46_spill]] %s4946_s7 }
   0x9   :  { %4988 = sst [smem:[#allocation47_spill]] %s4947_s8 }
   0xa   :  { %4989 = sst [smem:[#allocation48_spill]] %s4948_s9 }
   0xb   :  { %4990 = sst [smem:[#allocation49_spill]] %s4949_s10 }
   0xc   :  { %4991 = sst [smem:[#allocation50_spill]] %s4950_s11 }
   0xd   :  { %4992 = sst [smem:[#allocation51_spill]] %s4951_s12 }
   0xe   :  { %4993 = sst [smem:[#allocation52_spill]] %s4952_s13 }
   0xf   :  { %4994 = sst [smem:[#allocation53_spill]] %s4953_s14 }
  0x10   :  { %4995 = sst [smem:[#allocation54_spill]] %s4954_s15 }
  0x11   :  { %4996 = sst [smem:[#allocation55_spill]] %s4955_s16 }
  0x12   :  { %4997 = sst [smem:[#allocation56_spill]] %s4956_s17 }
  0x13   :  { %4998 = sst [smem:[#allocation57_spill]] %s4957_s18 }
  0x14   :  { %4999 = sst [smem:[#allocation58_spill]] %s4958_s19 }
  0x15   :  { %25 = vsyncpa [#allocation4], 0 }
  0x16   :  { %27 = vsyncpa [#allocation4 + $0x1], 0 }
  0x17   :  { %28 = vsyncpa [#allocation7], 0 }
  0x18   :  { %30 = vsyncpa [#allocation7 + $0x1], 0 }
  0x19   :  { %31 = vsyncpa [#allocation10], 0 }
  0x1a   :  { %33 = vsyncpa [#allocation10 + $0x1], 0 }
  0x1b   :  { %34 = vsyncpa [#allocation13], 0 }
  0x1c   :  { %35 = vsyncpa [#allocation5], 0 }
  0x1d   :  { %37 = vsyncpa [#allocation5 + $0x1], 0 }
  0x1e   :  { %38 = vsyncpa [#allocation17], 0 }
  0x1f   :  { %40 = vsyncpa [#allocation17 + $0x1], 0  ;;  %s4216_s0 = smov 0   ;;  %s4218_s30 = smov 0  }
  0x20   :  { %s4220_s20 = smov 0   ;;  %s4222_s21 = smov 0  }
  0x21   :  { %s4224_s1 = smov 0   ;;  %s4226_s22 = smov 0  }
  0x22   :  { %s4228_s2 = smov 0   ;;  %s4230_s23 = smov 0  }
  0x23   :  { %s4232_s24 = smov 0   ;;  %s4234_s25 = smov 0  }
  0x24   :  { %s4236_s3 = smov 0  }
  0x25 LB: > { %5000 = sst [smem:[#allocation25_spill]] %s4071_s20  ;;  %s4272_s26 = sadd.s32 4294967295, %s4103_s3   ;;  %s4103_s3 = sphi %s4236_s3, %s46_s3   ;;  %s4099_s25 = sphi %s4234_s25, %s5076_s25   ;;  %s4095_s24 = sphi %s4232_s24, %s5075_s24   ;;  %s4091_s23 = sphi %s4230_s23, %s5081_s23   ;;  %s4087_s2 = sphi %s4228_s2, %s5073_s2   ;;  %s4083_s22 = sphi %s4226_s22, %s5072_s22   ;;  %s4079_s1 = sphi %s4224_s1, %s5080_s1   ;;  %s4075_s21 = sphi %s4222_s21, %s5079_s21   ;;  %s4071_s20 = sphi %s4220_s20, %s5070_s20   ;;  %s4067_s30 = sphi %s4218_s30, %s5078_s30   ;;  %s4063_s0 = sphi %s4216_s0, %s5077_s0  }
  0x26   : > { %5001 = sst [smem:[#allocation26_spill]] %s4075_s21  ;;  %p3340_p0 = scmp.ge.s32.totalorder %s4103_s3, 1 }
  0x27   : > { %5002 = sst [smem:[#allocation27_spill]] %s4083_s22  ;;  %p79_p1 = scmp.eq.s32.totalorder %s4272_s26, 0 }
  0x28   : > { %5003 = sst [smem:[#allocation28_spill]] %s4087_s2  ;;  %p563_p2 = scmp.lt.s32.totalorder %s4103_s3, 5 }
  0x29   : > { %5004 = sst [smem:[#allocation29_spill]] %s4091_s23  ;;  %s4105_s18 = smov [#allocation12]  }
  0x2a   : > { %5005 = sst [smem:[#allocation30_spill]] %s4095_s24  ;;  %p4280_p3 = pnand %p3340_p0, %p563_p2 }
  0x2b   : > { %5006 = sst [smem:[#allocation31_spill]] %s4099_s25  ;;  %s576_s23 = sshll.u32 %s4105_s18, 4  ;;  %s577_s23 = int_to_ptr.vmem [resolvable:$true] %s576_s23 }
  0x2c   : > { %s5007_s14 = sld [smem:[#allocation53_spill]]  ;;  %p3468_p4 = pneg %p4280_p3 }
  0x2d   : > { %s4962_s28 = smov 64   ;;  %s3339_s17 = sadd.s32 4294967294, %s4103_s3  }
  0x2e   : > { %p4288_p5 = pnand %p3468_p4, %p79_p1  ;;  %p72_p6 = scmp.ne.s32.totalorder %s4083_s22, %s4079_s1 }
  0x2f   : > { %p73_p7 = scmp.eq.s32.totalorder %s4103_s3, 0  ;;  %p78_p8 = scmp.ne.s32.totalorder %s4079_s1, %s4075_s21 }
  0x30   : > { %p524_p9 = scmp.eq.s32.totalorder %s4272_s26, 3  ;;  %p530_p11 = scmp.eq.s32.totalorder %s3339_s17, 3 }
  0x31   : > { %p74_p10 = por %p73_p7, %p72_p6  ;;  %p4310_p12 = por %p79_p1, %p78_p8 }
  0x32   : > { %s574_s29 = sshll.u32 %s5007_s14, 4  ;;  %s4963_s14 = smov 4   ;;  %s575_s29 = int_to_ptr.hbm [resolvable:$true] %s574_s29 }
  0x33   : > { %3471 = dma.hbm_to_vmem [thread:$0]  (!%p4288_p5), %s575_s29, 256, %s577_s23, [#allocation13], %s4962_s28, %s4962_s28, %s4963_s14  }
  0x34   : > { %p4314_p13 = por %p524_p9, %p72_p6  ;;  %p4318_p0 = por %p530_p11, %p78_p8 }
  0x35   : > { %p4968_p2 = scmp.lt.s32.totalorder %s4103_s3, 4  ;;  %s4324_s17 = sand.u32 1, %s4083_s22  }
  0x36   : > { %s5011_s23 = scalar_select %p4314_p13, 1, 0 }
  0x37   : > { %s5013_s29 = scalar_select %p4318_p0, 1, 0 }
  0x38   : > { %5012 = sst [smem:[#allocation32_spill]] %s5011_s23  ;;  %s4970_s28 = sand.u32 1, %s4103_s3  }
  0x39   : > { %5014 = sst [smem:[#allocation33_spill]] %s5013_s29  ;;  %p4329_p4 = pnand %p4968_p2, %p74_p10 }
  0x3a   : > { %s5016_s21 = sld [smem:[#allocation40_spill]]  ;;  %s632_s11 = scalar_lea.vmem [#allocation6], %s4324_s17 }
  0x3b   : > { %s639_s10 = sshll.u32 %s632_s11, 4  ;;  %s4340_s9 = scalar_lea.sflag [#allocation7], %s4970_s28  ;;  %s640_s10 = int_to_ptr.vmem [resolvable:$true] %s639_s10 }
  0x3c   : > { %s55_s15 = sadd.s32 1, %s4095_s24  ;;  %p150_p8 = scmp.ne.s32.totalorder %s4071_s20, %s4067_s30 }
  0x3d   : > { %p56_p6 = scmp.ge.s32.totalorder %s55_s15, 2  ;;  %p156_p9 = scmp.ne.s32.totalorder %s4067_s30, %s4063_s0 }
  0x3e   : > { %s5018_s11 = sadd.s32 1, %s4099_s25  ;;  %p152_p10 = por %p150_p8, %p73_p7 }
  0x3f   : > { %s5083_s15 = smov (%p56_p6, %s55_s15), 0  ;;  %s5085_s11 = smov (!%p56_p6, %s5018_s11), %s4099_s25 }
  0x40   : > { %s635_s29 = scalar_lea.hbm %s5016_s21, %s4099_s25  ;;  %s143_s21 = sadd.s32 1, %s4071_s20 }
  0x41   : > { %s637_s23 = sshll.u32 %s635_s29, 4  ;;  %5017 = sst [smem:[#allocation34_spill]] %s5083_s15  ;;  %s638_s23 = int_to_ptr.hbm [resolvable:$true] %s637_s23 }
  0x42   : > { %3481 = dma.hbm_to_vmem [thread:$0]  (!%p4329_p4), %s638_s23, 16, %s640_s10, %s4340_s9  }
  0x43   : > { %s140_s18 = ssub.s32 %s4095_s24, %s5083_s15  ;;  %p60_p11 = scmp.ge.s32.totalorder %s5085_s11, 2 }
  0x44   : > { %p141_p2 = scmp.eq.s32.totalorder %s140_s18, 0  ;;  %p4362_p0 = por %p156_p9, %p79_p1 }
  0x45   : > { %s4367_s23 = sand.u32 1, %s4071_s20   ;;  %s5087_s11 = smov (%p60_p11, %s5085_s11), 0 }
  0x46   : > { %s5019_s10 = scalar_select %p4362_p0, 1, 0 }
  0x47   : > { %5021 = sst [smem:[#allocation36_spill]] %s5087_s11  ;;  %s62_s29 = ssub.s32 %s4099_s25, %s5087_s11 }
  0x48   : > { %5020 = sst [smem:[#allocation35_spill]] %s5019_s10  ;;  %p5023_p6 = scmp.lt.s32.totalorder %s4103_s3, 4 }
  0x49   : > { %s4372_s0 = scalar_select %p141_p2, %s4071_s20, %s143_s21  }
  0x4a   : > { %p4378_p13 = pnand %p5023_p6, %p152_p10  ;;  %p63_p7 = scmp.eq.s32.totalorder %s62_s29, 0 }
  0x4b   : > { %5022 = sst [smem:[#allocation37_spill]] %s4372_s0  ;;  %s5025_s18 = sadd.s32 1, %s4083_s22 }
  0x4c   : > { %s4385_s15 = scalar_select %p63_p7, %s4083_s22, %s5025_s18  }
  0x4d   : > { %s5027_s7 = sld [smem:[#allocation46_spill]]  ;;  %s694_s21 = scalar_lea.vmem [#allocation9], %s4367_s23 }
  0x4e   : > { %5026 = sst [smem:[#allocation38_spill]] %s4385_s15  ;;  %s701_s0 = sshll.u32 %s694_s21, 4  ;;  %s702_s0 = int_to_ptr.vmem [resolvable:$true] %s701_s0 }
  0x4f   : > { %s5028_s16 = sld [smem:[#allocation55_spill]]  ;;  %s5029_s10 = sand.u32 1, %s4103_s3  }
  0x50   : > { %s4397_s29 = scalar_lea.sflag [#allocation10], %s5029_s10  ;;  %s4108_s6 = smov [#allocation14]  }
  0x51   : > { %s593_s8 = sshll.u32 %s4108_s6, 4  ;;  %s5030_s18 = smov 4   ;;  %s594_s8 = int_to_ptr.vmem [resolvable:$true] %s593_s8 }
  0x52   : > { %s5031_s21 = smov 64   ;;  %s3345_s5 = sshll.u32 %s4099_s25, 3 }
  0x53   : > { %s697_s4 = scalar_lea.hbm %s5027_s7, %s4095_s24  ;;  %s5032_s7 = sld [smem:[#allocation39_spill]] }
  0x54   : > { %s699_s11 = sshll.u32 %s697_s4, 4  ;;  %s3344_s4 = sshll.u32 %s4324_s17, 3  ;;  %s700_s11 = int_to_ptr.hbm [resolvable:$true] %s699_s11 }
  0x55   : > { %s591_s2 = sshll.u32 %s5028_s16, 4  ;;  %s611_s27 = scalar_lea.sflag [#allocation4], %s4324_s17  ;;  %s592_s2 = int_to_ptr.hbm [resolvable:$true] %s591_s2 }
  0x56   : > { %3487 = dma.hbm_to_vmem [thread:$0]  (!%p4378_p13), %s700_s11, 16, %s702_s0, %s4397_s29  }
  0x57   : > { %3474 = dma.hbm_to_vmem [thread:$0]  (!%p4288_p5), %s592_s2, 256, %s594_s8, [#allocation13], %s5031_s21, %s5031_s21, %s5030_s18  }
  0x58   : > { %s614_s0 = scalar_lea.vmem [#allocation3], %s3344_s4  ;;  %s5033_s8 = sld [smem:[#allocation42_spill]] }
  0x59   : > { %s618_s11 = scalar_lea.hbm %s5032_s7, %s3345_s5  ;;  %s622_s16 = sshll.u32 %s614_s0, 4  ;;  %s623_s16 = int_to_ptr.vmem [resolvable:$true] %s622_s16 }
  0x5a   : > { %s620_s15 = sshll.u32 %s618_s11, 4  ;;  %s657_s21 = scalar_lea.vmem [#allocation8], %s4367_s23  ;;  %s621_s15 = int_to_ptr.hbm [resolvable:$true] %s620_s15 }
  0x5b   : > { %3478 = dma.hbm_to_vmem [thread:$0]  (!%p4329_p4), %s621_s15, 128, %s623_s16, %s611_s27  }
  0x5c   : > { %s664_s25 = sshll.u32 %s657_s21, 4  ;;  %s5034_s13 = sld [smem:[#allocation52_spill]]  ;;  %s665_s25 = int_to_ptr.vmem [resolvable:$true] %s664_s25 }
  0x5d   : > { %s745_s10 = scalar_lea.vmem [#allocation11], %s4367_s23  ;;  %s4434_s14 = sand.u32 (!%p4280_p3), 1, %s4079_s1  }
  0x5e   : > { %s660_s18 = scalar_lea.hbm %s5033_s8, %s4095_s24  ;;  %s752_s11 = sshll.u32 %s745_s10, 4  ;;  %s753_s11 = int_to_ptr.vmem [resolvable:$true] %s752_s11 }
  0x5f   : > { %s662_s20 = sshll.u32 %s660_s18, 4  ;;  %s764_s16 = scalar_lea.sflag (!%p4280_p3), [#allocation4], %s4434_s14  ;;  %s663_s20 = int_to_ptr.hbm [resolvable:$true] %s662_s20 }
  0x60   : > { %3484 = dma.hbm_to_vmem [thread:$0]  (!%p4378_p13), %s663_s20, 16, %s665_s25, %s4340_s9  }
  0x61   : > { %761 = sbr.rel (%p4280_p3) target bundleno = 3332 (0xd04), region = 92  ;;  %s3347_s9 = sshll.u32 (!%p4280_p3), %s4434_s14, 3 }
  0x62   : > { %s748_s5 = scalar_lea.hbm %s5034_s13, %s4095_s24  ;;  %s4438_s25 = scalar_lea.vmem (!%p4280_p3), [#allocation3], %s3347_s9 }
  0x63   : > { %s750_s17 = sshll.u32 %s748_s5, 4  ;;  %s751_s17 = int_to_ptr.hbm [resolvable:$true] %s750_s17 }
  0x64   : > { %3490 = dma.hbm_to_vmem [thread:$0]  (!%p4378_p13), %s751_s17, 16, %s753_s11, %s4397_s29  }
  0x66   : > { %4034 = dma.done.wait (%p4310_p12), %s764_s16, 128  }
  0x67   : > { %4036 = vsyncadd (%p4310_p12), %s764_s16, 4294967168  ;;  %s773_s19 = sand.u32 1, %s4272_s26  }
  0x68   : > { %s774_s28 = scalar_lea.sflag [#allocation7], %s773_s19 }
  0x69   : > { %4038 = dma.done.wait (%p4310_p12), %s774_s28, 16  }
  0x6a   : > { %4040 = vsyncadd (%p4310_p12), %s774_s28, 4294967280  ;;  %s4451_s29 = sand.u32 1, %s4067_s30  }
  0x6b   : > { %4042 = dma.done.wait (%p4362_p0), %s774_s28, 16  }
  0x6c   : > { %4044 = vsyncadd (%p4362_p0), %s774_s28, 4294967280  ;;  %s792_s27 = scalar_lea.sflag [#allocation10], %s773_s19 }
  0x6d   : > { %4046 = dma.done.wait (%p4362_p0), %s792_s27, 32  }
  0x6e   : > { %4048 = vsyncadd (%p4362_p0), %s792_s27, 4294967264 }
  0x6f   : > { %4050 = dma.done.wait (%p79_p1), [#allocation13], 512  }
  0x70   : > { %4052 = vsyncadd (%p79_p1), [#allocation13], 4294966784  ;;  %s5036_s6 = sld [smem:[#allocation28_spill]]  ;;  %s922_s2 = scalar_lea.vmem [#allocation16], %s4434_s14 }
  0x71   : > { %s5038_s10 = sld [smem:[#allocation41_spill]] }
  0x72   : > { %s5039_s16 = sld [smem:[#allocation43_spill]] }
  0x73   : > { %s5041_s0 = sld [smem:[#allocation47_spill]] }
  0x74   : > { %s5042_s7 = sld [smem:[#allocation48_spill]] }
  0x75   : > { %s5043_s24 = sld [smem:[#allocation49_spill]] }
  0x76   : > { %p923_p3 = scmp.lt.s32.totalorder %s5036_s6, 1  ;;  %s5044_s22 = sld [smem:[#allocation50_spill]] }
  0x77   : > { %s5045_s12 = sld [smem:[#allocation51_spill]]  ;;  %p3358_p1 = scmp.ne.s32.totalorder %s5036_s6, 0 }
  0x78   : > { %s4470_s8 = scalar_select %p923_p3, %s5036_s6, 1 }
  0x7a   : > { %s3428_s18 = sshll.u32 %s4470_s8, 4  ;;  %s946_s26 = scalar_lea.vmem %s5042_s7, %s4470_s8 }
  0x7b   : > { %s927_s11 = scalar_lea.vmem %s5038_s10, %s3428_s18  ;;  %s4483_s19 = scalar_lea.vmem %s5039_s16, %s3428_s18 }
  0x7c   : > { %s4492_s13 = scalar_lea.vmem %s5041_s0, %s3428_s18  ;;  %s3431_s4 = sshll.u32 %s4470_s8, 5 }
  0x7d   : > { %s4502_s17 = scalar_lea.vmem %s5043_s24, %s3431_s4  ;;  %s954_s28 = scalar_lea.vmem %s5044_s22, %s4470_s8 }
  0x7e   : > { %s957_s15 = scalar_lea.vmem %s5045_s12, %s4470_s8  ;;  %s916_s0 = scalar_lea.vmem [#allocation15], %s4434_s14 }
  0x7f   : > { %962 = sbr.rel (%p3358_p1) target bundleno = 134 (0x86), region = 124 }
  0x84   : > { %v963_v0 = vld [vmem:[%s4438_s25] sm:$0xff]  ;;  %vm964_vm0 = vcmask 261120  }
  0x85   : > { %965 = vst.msk [vmem:[#allocation2] sm:$0xff] %vm964_vm0, %v963_v0 }
  0x86 PF: > { %v3433_v1 = vld [vmem:[%s927_s11 + $0x8] sm:$0xff]  ;;  %v3432_v2 = vld [vmem:[%s927_s11] sm:$0xff]  ;;  %vm1014_vm1 = vcmask 261120   ;;  %s5046_s22 = scalar_lea.vmem [#allocation8], %s4451_s29  ;;  %s4109_s24 = smov 112   ;;  %vm1036_vm2 = vcmask 1047556  }
  0x87   : > { %1024 = vmatpush.bf16.msra.mxu0 %v3433_v1  ;;  %v3696_v5 = vld [vmem:[%s5046_s22] ss:$0 sm:$0xff]  ;;  %s4110_s25 = smov 96   ;;  %v4111_v11 = vmov 1983009808   ;;  %s4113_s12 = smov 64  }
  0x88   : > { %v1039_v12 = vunpack.c.l.s4 %v4111_v11  ;;  %v4112_v17 = vmov 1934713408   ;;  %vm1875_vm3 = vcmask 130048   ;;  %s5047_s6 = scalar_lea.vmem [#allocation6], %s4434_s14  ;;  %vm1915_vm4 = vcmask 64512   ;;  %s4114_s18 = smov 16  }
  0x89   : > { %v1061_v18 = vunpack.c.l.s4 %v4112_v17  ;;  %s5048_s21 = sld [smem:[#allocation44_spill]]  ;;  %s5052_s10 = scalar_lea.vmem [#allocation9], %s4451_s29  ;;  %vm2896_vm9 = vcmask 523264  }
  0x8a   : > { %v4529_v14 = vunpack.c.0.s8 %v1039_v12  ;;  %s5050_s4 = sld [smem:[#allocation45_spill]] }
  0x8b   : > { %1025 = vmatpush.bf16.msra.mxu0 %v3432_v2  ;;  %v4535_v26 = vunpack.c.0.s8 %v1061_v18 }
  0x8c   : > { %v969_v3 = vld [vmem:[#allocation2] sm:$0xff] }
  0x8d   : > { %v998_v4 = vpack.c.bf16 %v969_v3, %v969_v3 }
  0x8f   : > { %3367 = vmatmul.msk.bf16.vlgmr.msra.gmra.mxu0 %vm1014_vm1, %v998_v4  ;;  %s5049_s20 = scalar_lea.vmem %s5048_s21, %s4470_s8 }
  0x90   : > { %s5051_s5 = scalar_lea.vmem %s5050_s4, %s4470_s8 }
 0x10c   : > { %v1027_v6 = vpop.f32.mrf.mxu0 }
 0x10d   : > { %v4519_v7 = vadd.f32 %v3696_v5, %v1027_v6 }
 0x10f   : > { %1032 = vrot.lane.b32.xlu0 %v4519_v7, %s4109_s24 }
 0x114   : > { %v1029_v8 = vpop.f32.mrf.mxu0 }
 0x181   : > { %v4522_v9 = vpop.permute.xlu0 %1032 }
 0x182   : > { %v4526_v10 = vpack.i.bf16 %v4519_v7, %v4522_v9 }
 0x184   : > { %3606 = vrot.lane.b32.xlu0 %v4526_v10, %s4110_s25  ;;  %s5056_s25 = scalar_lea.vmem [#allocation11], %s4451_s29 }
 0x1f6   : > { %v3607_v13 = vpop.permute.xlu0 %3606 }
 0x1f7   : > { %v3609_v15 = vunpack.i.h.bf16 %v3607_v13  ;;  %v3608_v16 = vunpack.i.l.bf16 %v3607_v13 }
 0x1f9   : > { %v1094_v19 = vrot.slane %v3609_v15, 4  ;;  %v1099_v20 = vperm.slane %v3609_v15, %v4529_v14  ;;  %v1104_v21 = vrot.slane %v3608_v16, 4  ;;  %v1109_v25 = vperm.slane %v3608_v16, %v4529_v14 }
 0x1fb   : > { %v1095_v22 = vsel %vm1036_vm2, 0.0, %v1094_v19  ;;  %v1116_v23 = vrot.slane %v1099_v20, 4  ;;  %v1105_v24 = vsel %vm1036_vm2, 0.0, %v1104_v21  ;;  %v1114_v34 = vrot.slane %v1109_v25, 4 }
 0x1fc   : > { %v1103_v27 = vperm.slane %v1095_v22, %v4529_v14  ;;  %v1113_v30 = vperm.slane %v1105_v24, %v4529_v14 }
 0x1fd   : > { %v1117_v28 = vsel %vm1036_vm2, %v1109_v25, %v1116_v23  ;;  %v1115_v42 = vsel %vm1036_vm2, %v1114_v34, %v1099_v20 }
 0x1fe   : > { %v1128_v29 = vrot.slane %v1103_v27, 4  ;;  %v1125_v31 = vperm.slane %v1117_v28, %v4535_v26  ;;  %v1126_v40 = vrot.slane %v1113_v30, 4  ;;  %v1121_v45 = vperm.slane %v1115_v42, %v4535_v26 }
 0x200   : > { %v1140_v32 = vrot.slane %v1125_v31, 4  ;;  %v1129_v33 = vsel %vm1036_vm2, %v1113_v30, %v1128_v29  ;;  %v1214_v37 = vpack.c.bf16 %v1125_v31, %v1125_v31  ;;  %v1127_v46 = vsel %vm1036_vm2, %v1126_v40, %v1103_v27 }
 0x201   : > { %v1137_v35 = vperm.slane %v1129_v33, %v4535_v26  ;;  %v1133_v47 = vperm.slane %v1127_v46, %v4535_v26  ;;  %v1138_v48 = vrot.slane %v1121_v45, 4  ;;  %v1212_v51 = vpack.c.bf16 %v1121_v45, %v1121_v45 }
 0x202   : > { %v1141_v36 = vsel %vm1036_vm2, 0.0, %v1140_v32 }
 0x203   : > { %v1215_v38 = vpack.c.bf16 %v1141_v36, %v1141_v36  ;;  %v1144_v39 = vrot.slane %v1137_v35, 4  ;;  %v1218_v43 = vpack.c.bf16 %v1137_v35, %v1137_v35  ;;  %v1142_v49 = vrot.slane %v1133_v47, 4 }
 0x204   : > { %v1139_v50 = vsel %vm1036_vm2, 0.0, %v1138_v48  ;;  %v1216_v54 = vpack.c.bf16 %v1133_v47, %v1133_v47 }
 0x205   : > { %3610 = vxpose.binary.xlu1.c.b16.start.end [1/2] (short) (narrow) %v1215_v38, %v1214_v37, 16  ;;  %v1145_v41 = vsel %vm1036_vm2, 0.0, %v1144_v39  ;;  %v1213_v52 = vpack.c.bf16 %v1139_v50, %v1139_v50  ;;  %v1143_v53 = vsel %vm1036_vm2, 0.0, %v1142_v49 }
 0x206   : > { %v1219_v44 = vpack.c.bf16 %v1145_v41, %v1145_v41  ;;  %v1217_v55 = vpack.c.bf16 %v1143_v53, %v1143_v53 }
 0x208   : > { %3616 = vxpose.binary.xlu2.c.b16.start.end [1/2] (short) (narrow) %v1219_v44, %v1218_v43, 16 }
 0x215   : > { %3613 = vxpose.binary.xlu1.c.b16.start.end [1/2] (short) (narrow) %v1213_v52, %v1212_v51, 16 }
 0x218   : > { %3619 = vxpose.binary.xlu2.c.b16.start.end [1/2] (short) (narrow) %v1217_v55, %v1216_v54, 16 }
 0x2a9   : > { %v3617_v56 = vpop.trf.xlu2 }
 0x2aa   : > { %v1419_v61 = vshrl.u32 %v3617_v56, 16 }
 0x2b1   : > { %v3611_v57 = vpop.trf.xlu1  ;;  %v3618_v58 = vpop.trf.xlu2 }
 0x2b2   : > { %v1420_v62 = vshrl.u32 %v3618_v58, 16  ;;  %v1403_v1 = vshrl.u32 %v3611_v57, 16  ;;  %v1417_v2 = vpack.i.b16 %v3618_v58, %v3617_v56 }
 0x2b4   : > { %v1421_v3 = vpack.i.b16 %v1420_v62, %v1419_v61  ;;  %v1435_v11 = vrot.slane %v1417_v2, 4 }
 0x2b6   : > { %v1491_v12 = vrot.slane %v1421_v3, 4 }
 0x2b9   : > { %v3612_v59 = vpop.trf.xlu1  ;;  %v3620_v60 = vpop.trf.xlu2 }
 0x2ba   : > { %v1404_v63 = vshrl.u32 %v3612_v59, 16  ;;  %v1401_v0 = vpack.i.b16 %v3612_v59, %v3611_v57  ;;  %v1411_v13 = vshrl.u32 %v3620_v60, 16 }
 0x2bc   : > { %v1405_v4 = vpack.i.b16 %v1404_v63, %v1403_v1  ;;  %v1437_v8 = vrot.slane %v1401_v0, 4  ;;  %v1436_v17 = vsel %vm1036_vm2, %v1435_v11, %v1401_v0 }
 0x2bd   : > { %v1442_v22 = vperm.slane %v1436_v17, %v4529_v14 }
 0x2be   : > { %v1493_v16 = vrot.slane %v1405_v4, 4  ;;  %v1438_v18 = vsel %vm1036_vm2, %v1417_v2, %v1437_v8  ;;  %v1492_v19 = vsel %vm1036_vm2, %v1491_v12, %v1405_v4 }
 0x2bf   : > { %v1446_v23 = vperm.slane %v1438_v18, %v4529_v14  ;;  %v1498_v25 = vperm.slane %v1492_v19, %v4529_v14  ;;  %v1447_v36 = vrot.slane %v1442_v22, 4 }
 0x2c0   : > { %v1494_v24 = vsel %vm1036_vm2, %v1421_v3, %v1493_v16 }
 0x2c1   : > { %v3614_v5 = vpop.trf.xlu1  ;;  %v3621_v6 = vpop.trf.xlu2  ;;  %v1502_v37 = vperm.slane %v1494_v24, %v4529_v14  ;;  %v1503_v39 = vrot.slane %v1498_v25, 4  ;;  %v1459_v43 = vrot.slane %v1446_v23, 4 }
 0x2c2   : > { %v1412_v15 = vshrl.u32 %v3621_v6, 16  ;;  %v1409_v20 = vpack.i.b16 %v3621_v6, %v3620_v60  ;;  %v1395_v28 = vshrl.u32 %v3614_v5, 16 }
 0x2c3   : > { %v1515_v52 = vrot.slane %v1502_v37, 4 }
 0x2c4   : > { %v1413_v21 = vpack.i.b16 %v1412_v15, %v1411_v13  ;;  %v1423_v29 = vrot.slane %v1409_v20, 4 }
 0x2c6   : > { %v1479_v32 = vrot.slane %v1413_v21, 4 }
 0x2c9   : > { %v3615_v27 = vpop.trf.xlu1 }
 0x2ca   : > { %v1393_v30 = vpack.i.b16 %v3615_v27, %v3614_v5  ;;  %v1396_v31 = vshrl.u32 %v3615_v27, 16  ;;  %v1035_v27 = vrot.slane %v4519_v7, 4 }
 0x2cc   : > { %v1397_v33 = vpack.i.b16 %v1396_v31, %v1395_v28  ;;  %v1424_v34 = vsel %vm1036_vm2, %v1423_v29, %v1393_v30  ;;  %v1425_v35 = vrot.slane %v1393_v30, 4  ;;  %v1046_v31 = vrot.slane %v4522_v9, 4 }
 0x2cd   : > { %v1430_v38 = vperm.slane %v1424_v34, %v4529_v14 }
 0x2ce   : > { %v1426_v40 = vsel %vm1036_vm2, %v1409_v20, %v1425_v35  ;;  %v1480_v41 = vsel %vm1036_vm2, %v1479_v32, %v1397_v33  ;;  %v1481_v42 = vrot.slane %v1397_v33, 4  ;;  %v1037_v32 = vsel %vm1036_vm2, 0.0, %v1035_v27 }
 0x2cf   : > { %v1434_v44 = vperm.slane %v1426_v40, %v4529_v14  ;;  %v1449_v45 = vrot.slane %v1430_v38, 4  ;;  %v1486_v46 = vperm.slane %v1480_v41, %v4529_v14  ;;  %v1448_v47 = vsel %vm1036_vm2, %v1447_v36, %v1430_v38 }
 0x2d0   : > { %v1482_v48 = vsel %vm1036_vm2, %v1413_v21, %v1481_v42  ;;  %v1454_v53 = vperm.slane %v1448_v47, %v4535_v26  ;;  %v1047_v33 = vsel %vm1036_vm2, 0.0, %v1046_v31  ;;  %v1045_v34 = vperm.slane %v1037_v32, %v4529_v14 }
 0x2d1   : > { %v1504_v49 = vsel %vm1036_vm2, %v1503_v39, %v1486_v46  ;;  %v1460_v50 = vsel %vm1036_vm2, %v1459_v43, %v1434_v44  ;;  %v1490_v51 = vperm.slane %v1482_v48, %v4529_v14  ;;  %v1450_v55 = vsel %vm1036_vm2, %v1442_v22, %v1449_v45 }
 0x2d2   : > { %v1510_v54 = vperm.slane %v1504_v49, %v4535_v26  ;;  %v1505_v56 = vrot.slane %v1486_v46, 4  ;;  %v1466_v58 = vperm.slane %v1460_v50, %v4535_v26  ;;  %v1458_v61 = vperm.slane %v1450_v55, %v4535_v26 }
 0x2d3   : > { %v1516_v57 = vsel %vm1036_vm2, %v1515_v52, %v1490_v51  ;;  %v1461_v63 = vrot.slane %v1434_v44, 4  ;;  %v1517_v0 = vrot.slane %v1490_v51, 4  ;;  %v1471_v17 = vrot.slane %v1454_v53, 4 }
 0x2d4   : > { %3628 = vxpose.binary.xlu2.c.b16.start.end [1/2] (short) (narrow) %v1510_v54, %v1454_v53, 16  ;;  %v1522_v59 = vperm.slane %v1516_v57, %v4535_v26  ;;  %v1506_v60 = vsel %vm1036_vm2, %v1498_v25, %v1505_v56  ;;  %v1475_v5 = vrot.slane %v1466_v58, 4  ;;  %v1527_v18 = vrot.slane %v1510_v54, 4 }
 0x2d5   : > { %v1514_v62 = vperm.slane %v1506_v60, %v4535_v26  ;;  %v1462_v1 = vsel %vm1036_vm2, %v1446_v23, %v1461_v63  ;;  %v1518_v2 = vsel %vm1036_vm2, %v1502_v37, %v1517_v0  ;;  %v1473_v19 = vrot.slane %v1458_v61, 4 }
 0x2d6   : > { %3622 = vxpose.binary.xlu1.c.b16.start.end [1/2] (short) (narrow) %v1522_v59, %v1466_v58, 16  ;;  %v1470_v3 = vperm.slane %v1462_v1, %v4535_v26  ;;  %v1526_v4 = vperm.slane %v1518_v2, %v4535_v26  ;;  %v1531_v6 = vrot.slane %v1522_v59, 4  ;;  %v1476_v12 = vsel %vm1036_vm2, 0, %v1475_v5 }
 0x2d7   : > { %3634 = vxpose.binary.xlu0.c.b16.start.end [1/2] (short) (narrow) %v1514_v62, %v1458_v61, 16  ;;  %v1529_v20 = vrot.slane %v1514_v62, 4  ;;  %v1472_v21 = vsel %vm1036_vm2, 0, %v1471_v17  ;;  %v1528_v22 = vsel %vm1036_vm2, 0, %v1527_v18  ;;  %v1474_v23 = vsel %vm1036_vm2, 0, %v1473_v19 }
 0x2d8   : > { %v1477_v8 = vrot.slane %v1470_v3, 4  ;;  %v1533_v11 = vrot.slane %v1526_v4, 4  ;;  %v1532_v13 = vsel %vm1036_vm2, 0, %v1531_v6  ;;  %v1070_v38 = vrot.slane %v1045_v34, 4 }
 0x2d9   : > { %v1530_v24 = vsel %vm1036_vm2, 0, %v1529_v20  ;;  %v1041_v39 = vperm.slane %v4519_v7, %v4529_v14  ;;  %v1051_v40 = vperm.slane %v4522_v9, %v4529_v14 }
 0x2da   : > { %v1478_v15 = vsel %vm1036_vm2, 0, %v1477_v8  ;;  %v1534_v16 = vsel %vm1036_vm2, 0, %v1533_v11 }
 0x2db   : > { %v1058_v43 = vrot.slane %v1041_v39, 4  ;;  %v1056_v46 = vrot.slane %v1051_v40, 4 }
 0x2dd   : > { %v1059_v49 = vsel %vm1036_vm2, %v1051_v40, %v1058_v43  ;;  %v1057_v52 = vsel %vm1036_vm2, %v1056_v46, %v1041_v39 }
 0x2de   : > { %v1067_v9 = vperm.slane %v1059_v49, %v4535_v26  ;;  %v1063_v53 = vperm.slane %v1057_v52, %v4535_v26 }
 0x2e0   : > { %v1082_v57 = vrot.slane %v1067_v9, 4  ;;  %v1080_v62 = vrot.slane %v1063_v53, 4 }
 0x2e2   : > { %v1083_v1 = vsel %vm1036_vm2, 0.0, %v1082_v57 }
 0x2e3   : > { %v1207_v11 = vpack.c.bf16 %v1083_v1, %v1083_v1 }
 0x2e4   : > { %3631 = vxpose.binary.xlu2.c.b16.start.end [1/2] (short) (narrow) %v1532_v13, %v1476_v12, 16 }
 0x2e6   : > { %3625 = vxpose.binary.xlu1.c.b16.start.end [1/2] (short) (narrow) %v1526_v4, %v1470_v3, 16 }
 0x2e7   : > { %3637 = vxpose.binary.xlu0.c.b16.start.end [1/2] (short) (narrow) %v1534_v16, %v1478_v15, 16  ;;  %v1081_v16 = vsel %vm1036_vm2, 0.0, %v1080_v62 }
 0x2f4   : > { %3645 = vxpose.binary.xlu2.c.b16.start.end [1/2] (short) (narrow) %v1528_v22, %v1472_v21, 16  ;;  %v1206_v21 = vpack.c.bf16 %v1067_v9, %v1067_v9 }
 0x2f6   : > { %3648 = vxpose.binary.xlu1.c.b16.start.end [1/2] (short) (narrow) %v1530_v24, %v1474_v23, 16 }
 0x355   : > { %3641 = vrot.lane.b32.xlu0 %v4526_v10, %s4113_s12  ;;  %v1055_v10 = vperm.slane %v1047_v33, %v4529_v14  ;;  %s5057_s12 = sld [smem:[#allocation28_spill]] }
 0x357   : > { %v1068_v41 = vrot.slane %v1055_v10, 4  ;;  %v1071_v42 = vsel %vm1036_vm2, %v1055_v10, %v1070_v38 }
 0x358   : > { %v1079_v44 = vperm.slane %v1071_v42, %v4535_v26  ;;  %v1204_v42 = vpack.c.bf16 %v1063_v53, %v1063_v53 }
 0x359   : > { %v1069_v47 = vsel %vm1036_vm2, %v1068_v41, %v1045_v34  ;;  %v1205_v34 = vpack.c.bf16 %v1081_v16, %v1081_v16 }
 0x35a   : > { %v1075_v50 = vperm.slane %v1069_v47, %v4535_v26  ;;  %v1086_v51 = vrot.slane %v1079_v44, 4  ;;  %v1210_v63 = vpack.c.bf16 %v1079_v44, %v1079_v44 }
 0x35b   : > { %p3407_p5 = scmp.ne.s32.totalorder %s5057_s12, 1 }
 0x35c   : > { %v1084_v54 = vrot.slane %v1075_v50, 4  ;;  %v1087_v56 = vsel %vm1036_vm2, 0.0, %v1086_v51  ;;  %v1227_v12 = vrot.slane %v1210_v63, 4  ;;  %v1208_v20 = vpack.c.bf16 %v1075_v50, %v1075_v50  ;;  %s5059_s11 = sld [smem:[#allocation56_spill]] (!%p3407_p5) }
 0x35d   : > { %v1211_v61 = vpack.c.bf16 %v1087_v56, %v1087_v56 }
 0x35e   : > { %v1085_v0 = vsel %vm1036_vm2, 0.0, %v1084_v54  ;;  %v1228_v38 = vsel %vm1036_vm2, %v1227_v12, %v1206_v21 }
 0x35f   : > { %v1209_v6 = vpack.c.bf16 %v1085_v0, %v1085_v0  ;;  %v1245_v8 = vrot.slane %v1211_v61, 4 }
 0x361   : > { %v1239_v27 = vrot.slane %v1209_v6, 4  ;;  %v1246_v31 = vsel %vm1036_vm2, %v1245_v8, %v1207_v11 }
 0x362   : > { %v1250_v41 = vperm.slane %v1246_v31, %v4529_v14 }
 0x363   : > { %v1240_v44 = vsel %vm1036_vm2, %v1239_v27, %v1205_v34 }
 0x364   : > { %v1251_v52 = vrot.slane %v1250_v41, 4 }
 0x375   : > { %v4592_v25 = vpop.trf.xlu2 }
 0x37d   : > { %v4595_v29 = vpop.trf.xlu2 }
 0x382   : > { %v3623_v28 = vpop.trf.xlu1 }
 0x383   : > { %v4597_v30 = vpop.trf.xlu0 }
 0x384   : > { %v1791_v17 = vrot.slane %v4597_v30, 4 }
 0x385   : > { %v3632_v37 = vpop.trf.xlu2 }
 0x386   : > { %v1792_v30 = vsel %vm1036_vm2, %v1791_v17, %v4592_v25 }
 0x38a   : > { %v3624_v35 = vpop.trf.xlu1 }
 0x38b   : > { %v4604_v36 = vpop.trf.xlu0 }
 0x38c   : > { %v1829_v43 = vrot.slane %v4604_v36, 4  ;;  %v1244_v36 = vperm.slane %v1240_v44, %v4529_v14 }
 0x38d   : > { %v3633_v7 = vpop.trf.xlu2 }
 0x38e   : > { %v1830_v9 = vsel %vm1036_vm2, %v1829_v43, %v4595_v29  ;;  %v1252_v62 = vsel %vm1036_vm2, %v1251_v52, %v1244_v36 }
 0x392   : > { %v3626_v45 = vpop.trf.xlu1 }
 0x393   : > { %v3638_v48 = vpop.trf.xlu0  ;;  %v1803_v4 = vrot.slane %v3626_v45, 4  ;;  %v1796_v45 = vperm.slane %v1792_v30, %v4529_v14 }
 0x394   : > { %v1809_v58 = vrot.slane %v3638_v48, 4  ;;  %v1232_v48 = vperm.slane %v1228_v38, %v4529_v14 }
 0x395   : > { %v3646_v3 = vpop.trf.xlu2  ;;  %v1804_v23 = vsel %vm1036_vm2, %v1803_v4, %v3623_v28  ;;  %v1256_v4 = vperm.slane %v1252_v62, %v4535_v26 }
 0x396   : > { %v1810_v2 = vsel %vm1036_vm2, %v1809_v58, %v3632_v37  ;;  %v1220_v37 = vrot.slane %v1208_v20, 4  ;;  %v1808_v39 = vperm.slane %v1804_v23, %v4529_v14  ;;  %v1233_v57 = vrot.slane %v1232_v48, 4 }
 0x397   : > { %v1814_v13 = vperm.slane %v1810_v2, %v4529_v14 }
 0x398   : > { %v1222_v50 = vsel %vm1036_vm2, %v1220_v37, %v1204_v42 }
 0x399   : > { %v1821_v32 = vrot.slane %v1814_v13, 4  ;;  %v1226_v56 = vperm.slane %v1222_v50, %v4529_v14  ;;  %v1261_v13 = vshrl.u32 %v1256_v4, 16 }
 0x39a   : > { %v3627_v55 = vpop.trf.xlu1 }
 0x39b   : > { %v3639_v59 = vpop.trf.xlu0  ;;  %v1841_v18 = vrot.slane %v3627_v55, 4  ;;  %v1822_v47 = vsel %vm1036_vm2, %v1821_v32, %v1808_v39  ;;  %v1234_v0 = vsel %vm1036_vm2, %v1233_v57, %v1226_v56 }
 0x39c   : > { %v1847_v60 = vrot.slane %v3639_v59, 4  ;;  %v1826_v54 = vperm.slane %v1822_v47, %v4535_v26  ;;  %v1238_v6 = vperm.slane %v1234_v0, %v4535_v26 }
 0x39d   : > { %v1842_v10 = vsel %vm1036_vm2, %v1841_v18, %v3624_v35  ;;  %v3647_v35 = vpop.trf.xlu2 }
 0x39e   : > { %v1848_v5 = vsel %vm1036_vm2, %v1847_v60, %v3633_v7  ;;  %v1846_v25 = vperm.slane %v1842_v10, %v4529_v14  ;;  %v1834_v60 = vperm.slane %v1830_v9, %v4529_v14  ;;  %v1827_v63 = vrot.slane %v1826_v54, 4  ;;  %v966_v9 = vld [vmem:[%s5047_s6] sm:$0x1] }
 0x39f   : > { %v1852_v22 = vperm.slane %v1848_v5, %v4529_v14  ;;  %v1259_v16 = vpack.i.b16 %v1256_v4, %v1238_v6  ;;  %v1260_v17 = vshrl.u32 %v1238_v6, 16 }
 0x3a1   : > { %v1859_v28 = vrot.slane %v1852_v22, 4  ;;  %v1262_v18 = vpack.i.b16 %v1261_v13, %v1260_v17 }
 0x3a2   : > { %v3649_v15 = vpop.trf.xlu1 }
 0x3a3   : > { %v1797_v19 = vrot.slane %v3649_v15, 4  ;;  %v1860_v7 = vsel %vm1036_vm2, %v1859_v28, %v1846_v25 }
 0x3a4   : > { %v1864_v59 = vperm.slane %v1860_v7, %v4535_v26 }
 0x3a5   : > { %v1798_v24 = vsel %vm1036_vm2, %v1797_v19, %v3646_v3 }
 0x3a6   : > { %v1802_v33 = vperm.slane %v1798_v24, %v4529_v14  ;;  %v1865_v3 = vrot.slane %v1864_v59, 4 }
 0x3a8   : > { %v1815_v40 = vrot.slane %v1802_v33, 4 }
 0x3aa   : > { %v3650_v46 = vpop.trf.xlu1  ;;  %v1816_v51 = vsel %vm1036_vm2, %v1815_v40, %v1796_v45 }
 0x3ab   : > { %v1835_v49 = vrot.slane %v3650_v46, 4  ;;  %v1820_v58 = vperm.slane %v1816_v51, %v4535_v26 }
 0x3ad   : > { %v1836_v53 = vsel %vm1036_vm2, %v1835_v49, %v3647_v35  ;;  %v1828_v1 = vsel %vm1036_vm2, %v1827_v63, %v1820_v58 }
 0x3ae   : > { %v1840_v55 = vperm.slane %v1836_v53, %v4529_v14  ;;  %v1871_v11 = vshrl.u32 %v1828_v1, 16  ;;  %v967_v53 = vsub.f32 1.0, %v966_v9 }
 0x3b0   : > { %v1853_v61 = vrot.slane %v1840_v55, 4  ;;  %v968_v54 = vmul.f32 -1e+09, %v967_v53 }
 0x3b2   : > { %v1854_v29 = vsel %vm1036_vm2, %v1853_v61, %v1834_v60  ;;  %v1911_v55 = vperm.slane %v968_v54, 0 }
 0x3b3   : > { %v1858_v2 = vperm.slane %v1854_v29, %v4535_v26 }
 0x3b5   : > { %v1866_v5 = vsel %vm1036_vm2, %v1865_v3, %v1858_v2 }
 0x3b6   : > { %v1869_v8 = vpack.i.b16 %v1866_v5, %v1828_v1  ;;  %v1872_v12 = vshrl.u32 %v1866_v5, 16 }
 0x3b8   : > { %1886 = vmatpush.bf16.msra.mxu1 %v1869_v8  ;;  %v1873_v15 = vpack.i.b16 %v1872_v12, %v1871_v11 }
 0x3ba   : > { %1902 = vmatpush.bf16.msra.mxu2 %v1873_v15 }
 0x3bb   : > { %3368 = vmatmul.msk.bf16.vlgmr.msra.gmra.mxu1 %vm1875_vm3, %v1259_v16 }
 0x3bd   : > { %3369 = vmatmul.msk.bf16.vlgmr.msra.gmra.mxu2 %vm1875_vm3, %v1262_v18 }
 0x3c7   : > { %v3642_v19 = vpop.permute.xlu0 %3641 }
 0x3c8   : > { %v3644_v20 = vunpack.i.h.bf16 %v3642_v19  ;;  %v3643_v21 = vunpack.i.l.bf16 %v3642_v19 }
 0x3ca   : > { %v1152_v22 = vrot.slane %v3644_v20, 4  ;;  %v1157_v23 = vperm.slane %v3644_v20, %v4529_v14  ;;  %v1162_v24 = vrot.slane %v3643_v21, 4  ;;  %v1167_v27 = vperm.slane %v3643_v21, %v4529_v14 }
 0x3cc   : > { %v1153_v31 = vsel %vm1036_vm2, 0.0, %v1152_v22  ;;  %v1174_v32 = vrot.slane %v1157_v23, 4  ;;  %v1163_v33 = vsel %vm1036_vm2, 0.0, %v1162_v24  ;;  %v1172_v34 = vrot.slane %v1167_v27, 4 }
 0x3cd   : > { %v1171_v30 = vperm.slane %v1163_v33, %v4529_v14  ;;  %v1161_v10 = vperm.slane %v1153_v31, %v4529_v14 }
 0x3ce   : > { %v1173_v37 = vsel %vm1036_vm2, %v1172_v34, %v1157_v23  ;;  %v1175_v38 = vsel %vm1036_vm2, %v1167_v27, %v1174_v32 }
 0x3cf   : > { %v1183_v39 = vperm.slane %v1175_v38, %v4535_v26  ;;  %v1184_v28 = vrot.slane %v1171_v30, 4  ;;  %v1186_v42 = vrot.slane %v1161_v10, 4  ;;  %v1179_v1 = vperm.slane %v1173_v37, %v4535_v26 }
 0x3d1   : > { %v1198_v40 = vrot.slane %v1183_v39, 4  ;;  %v1185_v41 = vsel %vm1036_vm2, %v1184_v28, %v1161_v10  ;;  %v1942_v45 = vpack.c.bf16 %v1183_v39, %v1183_v39  ;;  %v1187_v47 = vsel %vm1036_vm2, %v1171_v30, %v1186_v42 }
 0x3d2   : > { %v1191_v43 = vperm.slane %v1185_v41, %v4535_v26  ;;  %v1195_v50 = vperm.slane %v1187_v47, %v4535_v26  ;;  %v1196_v2 = vrot.slane %v1179_v1, 4  ;;  %v1940_v4 = vpack.c.bf16 %v1179_v1, %v1179_v1 }
 0x3d3   : > { %v1199_v44 = vsel %vm1036_vm2, 0.0, %v1198_v40 }
 0x3d4   : > { %v1943_v25 = vpack.c.bf16 %v1199_v44, %v1199_v44  ;;  %v1200_v46 = vrot.slane %v1191_v43, 4  ;;  %v1944_v48 = vpack.c.bf16 %v1191_v43, %v1191_v43  ;;  %v1202_v51 = vrot.slane %v1195_v50, 4 }
 0x3d5   : > { %v1946_v36 = vpack.c.bf16 %v1195_v50, %v1195_v50  ;;  %v1197_v3 = vsel %vm1036_vm2, 0.0, %v1196_v2 }
 0x3d6   : > { %3654 = vxpose.binary.xlu0.c.b16.start.end [1/2] (short) (narrow) %v1943_v25, %v1942_v45, 16  ;;  %v1201_v35 = vsel %vm1036_vm2, 0.0, %v1200_v46  ;;  %v1203_v7 = vsel %vm1036_vm2, 0.0, %v1202_v51  ;;  %v1941_v5 = vpack.c.bf16 %v1197_v3, %v1197_v3 }
 0x3d7   : > { %v1945_v49 = vpack.c.bf16 %v1201_v35, %v1201_v35  ;;  %v1947_v52 = vpack.c.bf16 %v1203_v7, %v1203_v7 }
 0x3d9   : > { %3657 = vxpose.binary.xlu2.c.b16.start.end [1/2] (short) (narrow) %v1945_v49, %v1944_v48, 16 }
 0x3e6   : > { %3660 = vxpose.binary.xlu0.c.b16.start.end [1/2] (short) (narrow) %v1947_v52, %v1946_v36, 16 }
 0x438   : > { %v1888_v56 = vpop.f32.mrf.mxu1 }
 0x439   : > { %v1908_v57 = vmul.f32 0.25, %v1888_v56 }
 0x43b   : > { %v1913_v58 = vadd.f32 %v1911_v55, %v1908_v57 }
 0x43d   : > { %v1916_v59 = vsel %vm1915_vm4, %v1913_v58, -inf }
 0x43e   : > { %1917 = vmax.xlane.f32.xlu1 %v1916_v59 }
 0x440   : > { %v1890_v60 = vpop.f32.mrf.mxu1  ;;  %v1904_v61 = vpop.f32.mrf.mxu2 }
 0x441   : > { %v1909_v62 = vmul.f32 0.25, %v1904_v61 }
 0x443   : > { %v1914_v63 = vadd.f32 %v1911_v55, %v1909_v62 }
 0x445   : > { %v1919_v0 = vsel %vm1915_vm4, %v1914_v63, -inf }
 0x448   : > { %v1906_v29 = vpop.f32.mrf.mxu2 }
 0x44a   : > { %1920 = vmax.xlane.f32.xlu2 %v1919_v0 }
 0x478   : > { %3651 = vxpose.binary.xlu1.c.b16.start.end [1/2] (short) (narrow) %v1941_v5, %v1940_v4, 16 }
 0x47a   : > { %v3658_v6 = vpop.trf.xlu2 }
 0x47b   : > { %v2096_v8 = vshrl.u32 %v3658_v6, 16 }
 0x482   : > { %v3659_v11 = vpop.trf.xlu2  ;;  %v3655_v31 = vpop.trf.xlu0 }
 0x483   : > { %v4688_v12 = vpack.i.b16 %v3659_v11, %v3658_v6  ;;  %v2097_v13 = vshrl.u32 %v3659_v11, 16  ;;  %v2088_v34 = vshrl.u32 %v3655_v31, 16 }
 0x485   : > { %v4690_v15 = vpack.i.b16 %v2097_v13, %v2096_v8  ;;  %v2108_v60 = vrot.slane %v4688_v12, 4 }
 0x487   : > { %v2164_v61 = vrot.slane %v4690_v15, 4 }
 0x48a   : > { %v3656_v32 = vpop.trf.xlu0 }
 0x48b   : > { %v2089_v30 = vshrl.u32 %v3656_v32, 16  ;;  %v2086_v10 = vpack.i.b16 %v3656_v32, %v3655_v31 }
 0x48d   : > { %v2090_v39 = vpack.i.b16 %v2089_v30, %v2088_v34  ;;  %v2122_v28 = vrot.slane %v2086_v10, 4 }
 0x48f   : > { %v2178_v42 = vrot.slane %v2090_v39, 4 }
 0x492   : > { %v3661_v33 = vpop.trf.xlu0 }
 0x493   : > { %v2104_v40 = vshrl.u32 %v3661_v33, 16 }
 0x49a   : > { %v3662_v37 = vpop.trf.xlu0 }
 0x49b   : > { %v2105_v41 = vshrl.u32 %v3662_v37, 16  ;;  %v2102_v43 = vpack.i.b16 %v3662_v37, %v3661_v33 }
 0x49d   : > { %v2106_v44 = vpack.i.b16 %v2105_v41, %v2104_v40  ;;  %v2123_v45 = vsel %vm1036_vm2, %v2102_v43, %v2122_v28 }
 0x49e   : > { %v2131_v49 = vperm.slane %v2123_v45, %v4529_v14 }
 0x49f   : > { %v2179_v46 = vsel %vm1036_vm2, %v2106_v44, %v2178_v42  ;;  %v2176_v13 = vrot.slane %v2106_v44, 4 }
 0x4a0   : > { %v2187_v7 = vperm.slane %v2179_v46, %v4529_v14  ;;  %v2144_v53 = vrot.slane %v2131_v49, 4 }
 0x4a2   : > { %v2200_v56 = vrot.slane %v2187_v7, 4 }
 0x4b1   : > { %v1918_v16 = vpop.xlane.xlu1 %1917 }
 0x4b2   : > { %v1922_v17 = vsub.f32 %v1913_v58, %v1918_v16 }
 0x4b4   : > { %v1924_v18 = vmul.f32 1.442695, %v1922_v17 }
 0x4b6   : > { %3704 = vpow2.f32 %v1924_v18 }
 0x4bc   : > { %v3705_v19 = vpop.eup %3704 }
 0x4bd   : > { %v1928_v20 = vsel %vm1915_vm4, %v3705_v19, 0.0  ;;  %v1921_v21 = vpop.xlane.xlu2 %1920 }
 0x4be   : > { %1929 = vadd.xlane.f32.xlu0 %v1928_v20  ;;  %v1923_v22 = vsub.f32 %v1914_v63, %v1921_v21 }
 0x4c0   : > { %v1926_v23 = vmul.f32 1.442695, %v1923_v22 }
 0x4c2   : > { %3706 = vpow2.f32 %v1926_v23 }
 0x4c8   : > { %v4693_v24 = vpop.eup %3706 }
 0x4c9   : > { %v1931_v27 = vsel %vm1915_vm4, %v4693_v24, 0.0 }
 0x4d8   : > { %1932 = vadd.xlane.f32.xlu1 %v1931_v27  ;;  %v2177_v27 = vsel %vm1036_vm2, %v2176_v13, %v2090_v39 }
 0x4d9   : > { %v2183_v34 = vperm.slane %v2177_v27, %v4529_v14 }
 0x524   : > { %v3652_v38 = vpop.trf.xlu1 }
 0x525   : > { %v2080_v35 = vshrl.u32 %v3652_v38, 16 }
 0x52c   : > { %v3653_v25 = vpop.trf.xlu1 }
 0x52d   : > { %v2078_v47 = vpack.i.b16 %v3653_v25, %v3652_v38  ;;  %v2081_v48 = vshrl.u32 %v3653_v25, 16 }
 0x52f   : > { %v2082_v50 = vpack.i.b16 %v2081_v48, %v2080_v35  ;;  %v2110_v51 = vrot.slane %v2078_v47, 4  ;;  %v2109_v4 = vsel %vm1036_vm2, %v2108_v60, %v2078_v47 }
 0x530   : > { %v2115_v16 = vperm.slane %v2109_v4, %v4529_v14 }
 0x531   : > { %v2111_v36 = vsel %vm1036_vm2, %v4688_v12, %v2110_v51  ;;  %v2166_v52 = vrot.slane %v2082_v50, 4  ;;  %v1930_v9 = vpop.xlane.xlu0 %1929  ;;  %v2165_v5 = vsel %vm1036_vm2, %v2164_v61, %v2082_v50  ;;  %v2120_v12 = vrot.slane %v2102_v43, 4 }
 0x532   : > { %v2119_v54 = vperm.slane %v2111_v36, %v4529_v14  ;;  %3708 = vrcp.f32 %v1930_v9  ;;  %v2171_v17 = vperm.slane %v2165_v5, %v4529_v14  ;;  %v2134_v31 = vrot.slane %v2115_v16, 4 }
 0x533   : > { %v2167_v55 = vsel %vm1036_vm2, %v4690_v15, %v2166_v52  ;;  %v2121_v23 = vsel %vm1036_vm2, %v2120_v12, %v2086_v10  ;;  %v2188_v50 = vrot.slane %v2183_v34, 4 }
 0x534   : > { %v2146_v57 = vrot.slane %v2119_v54, 4  ;;  %v2175_v58 = vperm.slane %v2167_v55, %v4529_v14  ;;  %v2145_v59 = vsel %vm1036_vm2, %v2144_v53, %v2119_v54  ;;  %v2190_v32 = vrot.slane %v2171_v17, 4 }
 0x535   : > { %v2151_v0 = vperm.slane %v2145_v59, %v4535_v26  ;;  %v2127_v33 = vperm.slane %v2121_v23, %v4529_v14 }
 0x536   : > { %v2201_v62 = vsel %vm1036_vm2, %v2200_v56, %v2175_v58  ;;  %v2147_v63 = vsel %vm1036_vm2, %v2131_v49, %v2146_v57  ;;  %v2202_v29 = vrot.slane %v2175_v58, 4  ;;  %v2191_v37 = vsel %vm1036_vm2, %v2183_v34, %v2190_v32 }
 0x537   : > { %v2207_v1 = vperm.slane %v2201_v62, %v4535_v26  ;;  %v2155_v2 = vperm.slane %v2147_v63, %v4535_v26  ;;  %v2135_v30 = vsel %vm1036_vm2, %v2127_v33, %v2134_v31  ;;  %v2199_v10 = vperm.slane %v2191_v37, %v4535_v26 }
 0x538   : > { %v3709_v3 = vpop.eup %3708  ;;  %v2203_v6 = vsel %vm1036_vm2, %v2187_v7, %v2202_v29  ;;  %v2143_v38 = vperm.slane %v2135_v30, %v4535_v26  ;;  %v2160_v46 = vrot.slane %v2151_v0, 4  ;;  %v2132_v49 = vrot.slane %v2127_v33, 4 }
 0x539   : > { %3681 = vxpose.binary.xlu1.c.b16.start.end [1/2] (short) (narrow) %v2207_v1, %v2151_v0, 16  ;;  %v1936_v8 = vmul.f32 %v3709_v3, %v3705_v19  ;;  %v2211_v11 = vperm.slane %v2203_v6, %v4535_v26  ;;  %v2162_v15 = vrot.slane %v2155_v2, 4  ;;  %v2214_v39 = vrot.slane %v2199_v10, 4 }
 0x53a   : > { %v2158_v28 = vrot.slane %v2143_v38, 4  ;;  %v2216_v35 = vrot.slane %v2207_v1, 4  ;;  %v2161_v47 = vsel %vm1036_vm2, 0, %v2160_v46  ;;  %v2133_v51 = vsel %vm1036_vm2, %v2132_v49, %v2115_v16 }
 0x53b   : > { %v1938_v18 = vpack.c.bf16 %v1936_v8, %v1936_v8  ;;  %v2218_v20 = vrot.slane %v2211_v11, 4  ;;  %v2163_v19 = vsel %vm1036_vm2, 0, %v2162_v15  ;;  %v2215_v42 = vsel %vm1036_vm2, 0, %v2214_v39 }
 0x53c   : > { %v2159_v41 = vsel %vm1036_vm2, 0, %v2158_v28  ;;  %v2217_v48 = vsel %vm1036_vm2, 0, %v2216_v35  ;;  %v2189_v7 = vsel %vm1036_vm2, %v2188_v50, %v2171_v17 }
 0x53d   : > { %v2562_v21 = vsel %vm1915_vm4, %v1938_v18, 0  ;;  %v2219_v22 = vsel %vm1036_vm2, 0, %v2218_v20  ;;  %v2195_v36 = vperm.slane %v2189_v7, %v4535_v26 }
 0x53e   : > { %2571 = vmatpush.bf16.xpose.msra.mxu3 %v2562_v21 }
 0x53f   : > { %3663 = vxpose.binary.xlu2.c.b16.start.end [1/2] (short) (narrow) %v2219_v22, %v2163_v19, 16  ;;  %v2212_v9 = vrot.slane %v2195_v36, 4 }
 0x541   : > { %v2213_v54 = vsel %vm1036_vm2, 0, %v2212_v9 }
 0x54b   : > { %v1933_v40 = vpop.xlane.xlu1 %1932 }
 0x54c   : > { %3710 = vrcp.f32 %v1933_v40 }
 0x54f   : > { %3666 = vxpose.binary.xlu2.c.b16.start.end [1/2] (short) (narrow) %v2215_v42, %v2159_v41, 16 }
 0x552   : > { %v3711_v43 = vpop.eup %3710 }
 0x553   : > { %v1937_v44 = vmul.f32 %v3711_v43, %v4693_v24  ;;  %v2139_v24 = vperm.slane %v2133_v51, %v4535_v26 }
 0x555   : > { %v1939_v45 = vpack.c.bf16 %v1937_v44, %v1937_v44  ;;  %v2156_v52 = vrot.slane %v2139_v24, 4 }
 0x557   : > { %v2582_v25 = vsel %vm1915_vm4, %v1939_v45, 0  ;;  %v2157_v53 = vsel %vm1036_vm2, 0, %v2156_v52 }
 0x558   : > { %2591 = vmatpush.bf16.xpose.msrb.mxu1 %v2582_v25 }
 0x55f   : > { %3669 = vxpose.binary.xlu2.c.b16.start.end [1/2] (short) (narrow) %v2217_v48, %v2161_v47, 16 }
 0x56f   : > { %3672 = vxpose.binary.xlu2.c.b16.start.end [1/2] (short) (narrow) %v2211_v11, %v2155_v2, 16 }
 0x57f   : > { %3675 = vxpose.binary.xlu2.c.b16.start.end [1/2] (short) (narrow) %v2213_v54, %v2157_v53, 16 }
 0x58f   : > { %3678 = vxpose.binary.xlu2.c.b16.start.end [1/2] (short) (narrow) %v2199_v10, %v2143_v38, 16 }
 0x59f   : > { %3684 = vxpose.binary.xlu2.c.b16.start.end [1/2] (short) (narrow) %v2195_v36, %v2139_v24, 16 }
 0x5e0   : > { %v3664_v55 = vpop.trf.xlu2 }
 0x5e1   : > { %v2494_v59 = vrot.slane %v3664_v55, 4 }
 0x5e5   : > { %v3682_v3 = vpop.trf.xlu1 }
 0x5e8   : > { %v3665_v56 = vpop.trf.xlu2 }
 0x5e9   : > { %v2532_v13 = vrot.slane %v3665_v56, 4 }
 0x5ed   : > { %v3683_v18 = vpop.trf.xlu1 }
 0x5f0   : > { %v3667_v57 = vpop.trf.xlu2 }
 0x5f1   : > { %v2482_v11 = vrot.slane %v3667_v57, 4 }
 0x5f8   : > { %v3668_v58 = vpop.trf.xlu2 }
 0x5f9   : > { %v2520_v32 = vrot.slane %v3668_v58, 4 }
 0x600   : > { %v3670_v60 = vpop.trf.xlu2 }
 0x601   : > { %v2495_v61 = vsel %vm1036_vm2, %v2494_v59, %v3670_v60  ;;  %v3435_v59 = vld [vmem:[%s4483_s19 + $0x8] sm:$0xff]  ;;  %v3434_v60 = vld [vmem:[%s4483_s19] sm:$0xff] }
 0x602   : > { %v2499_v6 = vperm.slane %v2495_v61, %v4529_v14  ;;  %2782 = vmatpush.bf16.msrb.mxu2 %v3435_v59 }
 0x604   : > { %v2506_v17 = vrot.slane %v2499_v6, 4 }
 0x606   : > { %2783 = vmatpush.bf16.msrb.mxu2 %v3434_v60 }
 0x608   : > { %v3671_v62 = vpop.trf.xlu2 }
 0x609   : > { %v2533_v20 = vsel %vm1036_vm2, %v2532_v13, %v3671_v62 }
 0x60a   : > { %v2537_v19 = vperm.slane %v2533_v20, %v4529_v14 }
 0x60c   : > { %v2544_v28 = vrot.slane %v2537_v19, 4 }
 0x610   : > { %v3673_v63 = vpop.trf.xlu2 }
 0x611   : > { %v2488_v4 = vrot.slane %v3673_v63, 4 }
 0x613   : > { %v2489_v5 = vsel %vm1036_vm2, %v2488_v4, %v3682_v3 }
 0x614   : > { %v2493_v12 = vperm.slane %v2489_v5, %v4529_v14 }
 0x616   : > { %v2507_v21 = vsel %vm1036_vm2, %v2506_v17, %v2493_v12 }
 0x617   : > { %v2511_v33 = vperm.slane %v2507_v21, %v4535_v26 }
 0x618   : > { %v3674_v29 = vpop.trf.xlu2 }
 0x619   : > { %v2526_v15 = vrot.slane %v3674_v29, 4  ;;  %v2512_v40 = vrot.slane %v2511_v33, 4 }
 0x61b   : > { %v2527_v23 = vsel %vm1036_vm2, %v2526_v15, %v3683_v18 }
 0x61c   : > { %v2531_v30 = vperm.slane %v2527_v23, %v4529_v14 }
 0x61e   : > { %v2545_v42 = vsel %vm1036_vm2, %v2544_v28, %v2531_v30 }
 0x61f   : > { %v2549_v46 = vperm.slane %v2545_v42, %v4535_v26 }
 0x620   : > { %v3676_v0 = vpop.trf.xlu2 }
 0x621   : > { %v2483_v16 = vsel %vm1036_vm2, %v2482_v11, %v3676_v0  ;;  %v2550_v50 = vrot.slane %v2549_v46, 4 }
 0x622   : > { %v2487_v22 = vperm.slane %v2483_v16, %v4529_v14 }
 0x624   : > { %v2500_v37 = vrot.slane %v2487_v22, 4 }
 0x628   : > { %v3677_v1 = vpop.trf.xlu2 }
 0x629   : > { %v2521_v10 = vsel %vm1036_vm2, %v2520_v32, %v3677_v1 }
 0x62a   : > { %v2525_v43 = vperm.slane %v2521_v10, %v4529_v14 }
 0x62c   : > { %v2538_v47 = vrot.slane %v2525_v43, 4 }
 0x630   : > { %v3679_v2 = vpop.trf.xlu2 }
 0x631   : > { %v2476_v27 = vrot.slane %v3679_v2, 4 }
 0x638   : > { %v3680_v8 = vpop.trf.xlu2 }
 0x639   : > { %v2514_v44 = vrot.slane %v3680_v8, 4 }
 0x640   : > { %v3685_v31 = vpop.trf.xlu2 }
 0x641   : > { %v2477_v34 = vsel %vm1036_vm2, %v2476_v27, %v3685_v31 }
 0x642   : > { %v2481_v38 = vperm.slane %v2477_v34, %v4529_v14 }
 0x644   : > { %v2501_v39 = vsel %vm1036_vm2, %v2500_v37, %v2481_v38 }
 0x645   : > { %v2505_v41 = vperm.slane %v2501_v39, %v4535_v26 }
 0x647   : > { %v2513_v45 = vsel %vm1036_vm2, %v2512_v40, %v2505_v41 }
 0x648   : > { %v3686_v25 = vpop.trf.xlu2  ;;  %v2555_v36 = vshrl.u32 %v2513_v45, 16 }
 0x649   : > { %v2515_v35 = vsel %vm1036_vm2, %v2514_v44, %v3686_v25 }
 0x64a   : > { %v2519_v48 = vperm.slane %v2515_v35, %v4529_v14 }
 0x64c   : > { %v2539_v49 = vsel %vm1036_vm2, %v2538_v47, %v2519_v48 }
 0x64d   : > { %v2543_v51 = vperm.slane %v2539_v49, %v4535_v26 }
 0x64f   : > { %v2551_v7 = vsel %vm1036_vm2, %v2550_v50, %v2543_v51 }
 0x650   : > { %v2554_v24 = vpack.i.b16 %v2551_v7, %v2513_v45  ;;  %v2556_v52 = vshrl.u32 %v2551_v7, 16 }
 0x652   : > { %3370 = vmatmul.msk.bf16.vlgmr.msra.gmra.mxu3 %vm1915_vm4, %v2554_v24  ;;  %v2557_v9 = vpack.i.b16 %v2556_v52, %v2555_v36 }
 0x654   : > { %3371 = vmatmul.msk.bf16.vlgmr.msrb.gmra.mxu1 %vm1915_vm4, %v2557_v9 }
 0x6d1   : > { %v2593_v53 = vpop.f32.mrf.mxu1 }
 0x6d5   : > { %v2573_v54 = vpop.f32.mrf.mxu3 }
 0x6d6   : > { %v3687_v55 = vpack.i.bf16 %v2593_v53, %v2573_v54  ;;  %v3720_v54 = vld [vmem:[#allocation2] sm:$0xff] }
 0x6d8   : > { %3688 = vxpose.xlu2.b32.start [1/2] (short) (narrow) %v3687_v55, 8 }
 0x6d9   : > { %v2595_v56 = vpop.f32.mrf.mxu1 }
 0x6dd   : > { %v2575_v57 = vpop.f32.mrf.mxu3 }
 0x6de   : > { %v3689_v58 = vpack.i.bf16 %v2595_v56, %v2575_v57 }
 0x6e0   : > { %3690 = vxpose.xlu2.b32.end [2/2] (short) (narrow) %v3689_v58, 8  ;;  %v4115_v58 = vmov 32.0  }
 0x6e1   : > { %3712 = vrcp.f32 %v4115_v58 }
 0x6e7   : > { %v3713_v59 = vpop.eup %3712 }
 0x6e8   : > { %v2794_v60 = vmul.f32 32.0, %v3713_v59  ;;  %vm2798_vm5 = vweird.f32 %v3713_v59 }
 0x771   : > { %v3691_v61 = vpop.trf.xlu2 }
 0x772   : > { %v3695_v62 = vunpack.i.h.bf16 %v3691_v61  ;;  %v3692_v63 = vunpack.i.l.bf16 %v3691_v61  ;;  %v2795_v61 = vsub.f32 1.0, %v2794_v60 }
 0x774   : > { %v2672_v29 = vrot.slane %v3695_v62, 4  ;;  %v2677_v0 = vperm.slane %v3695_v62, %v4529_v14  ;;  %v2662_v1 = vrot.slane %v3692_v63, 4  ;;  %v2667_v2 = vperm.slane %v3692_v63, %v4529_v14 }
 0x775   : > { %v2796_v62 = vmul.f32 %v3713_v59, %v2795_v61 }
 0x776   : > { %v2673_v3 = vsel %vm1036_vm2, 0.0, %v2672_v29  ;;  %v2682_v4 = vrot.slane %v2677_v0, 4  ;;  %v2663_v5 = vsel %vm1036_vm2, 0.0, %v2662_v1  ;;  %v2684_v6 = vrot.slane %v2667_v2, 4 }
 0x777   : > { %v2681_v8 = vperm.slane %v2673_v3, %v4529_v14  ;;  %v2671_v11 = vperm.slane %v2663_v5, %v4529_v14  ;;  %v2797_v63 = vadd.f32 %v3713_v59, %v2796_v62  ;;  %v3437_v5 = vld [vmem:[%s4492_s13 + $0x8] sm:$0xff]  ;;  %v3702_v62 = vld [vmem:[%s957_s15] ss:$0 sm:$0xff]  ;;  %s5058_s15 = sld [smem:[#allocation54_spill]] (!%p3407_p5) }
 0x778   : > { %v2683_v12 = vsel %vm1036_vm2, %v2682_v4, %v2667_v2  ;;  %v2685_v13 = vsel %vm1036_vm2, %v2677_v0, %v2684_v6  ;;  %2852 = vmatpush.bf16.msrb.mxu0 %v3437_v5  ;;  %v3436_v6 = vld [vmem:[%s4492_s13] sm:$0xff] }
 0x779   : > { %v2694_v15 = vrot.slane %v2681_v8, 4  ;;  %v2689_v16 = vperm.slane %v2683_v12, %v4535_v26  ;;  %v2693_v17 = vperm.slane %v2685_v13, %v4535_v26  ;;  %v2696_v18 = vrot.slane %v2671_v11, 4 }
 0x77a   : > { %v4814_v29 = vsel %vm2798_vm5, %v3713_v59, %v2797_v63 }
 0x77b   : > { %v2695_v20 = vsel %vm1036_vm2, %v2694_v15, %v2671_v11  ;;  %v2697_v21 = vsel %vm1036_vm2, %v2681_v8, %v2696_v18  ;;  %v2706_v22 = vrot.slane %v2689_v16, 4  ;;  %v2708_v23 = vrot.slane %v2693_v17, 4 }
 0x77c   : > { %v2701_v27 = vperm.slane %v2695_v20, %v4535_v26  ;;  %v2705_v19 = vperm.slane %v2697_v21, %v4535_v26  ;;  %2853 = vmatpush.bf16.msrb.mxu0 %v3436_v6  ;;  %v3698_v21 = vld [vmem:[%s5051_s5] ss:$0 sm:$0xff] }
 0x77d   : > { %v2709_v31 = vsel %vm1036_vm2, 0.0, %v2708_v23  ;;  %v2707_v30 = vsel %vm1036_vm2, 0.0, %v2706_v22  ;;  %v2714_v38 = vsel %vm1036_vm2, %v2708_v23, %v2689_v16 }
 0x77e   : > { %v2712_v32 = vrot.slane %v2705_v19, 4  ;;  %v2719_v33 = vrot.slane %v2709_v31, 4  ;;  %v2710_v34 = vrot.slane %v2701_v27, 4  ;;  %v2718_v41 = vperm.slane %v2714_v38, %v4529_v14  ;;  %v3700_v38 = vld [vmem:[%s946_s26] ss:$0 sm:$0xff] }
 0x780   : > { %v2713_v37 = vsel %vm1036_vm2, 0.0, %v2712_v32  ;;  %v2720_v10 = vsel %vm1036_vm2, %v2719_v33, %v2707_v30  ;;  %v2711_v40 = vsel %vm1036_vm2, 0.0, %v2710_v34  ;;  %v2725_v42 = vsel %vm1036_vm2, %v2712_v32, %v2701_v27  ;;  %v3699_v27 = vld [vmem:[%s5052_s10] ss:$0 sm:$0xff]  ;;  %v3441_v33 = vld [vmem:[%s4502_s17 + $0x18] sm:$0xff]  ;;  %v3440_v34 = vld [vmem:[%s4502_s17 + $0x10] sm:$0xff] }
 0x781   : > { %v2724_v28 = vperm.slane %v2720_v10, %v4529_v14  ;;  %v2730_v39 = vrot.slane %v2713_v37, 4  ;;  %v2729_v46 = vperm.slane %v2725_v42, %v4529_v14  ;;  %2904 = vmatpush.bf16.msrb.mxu3 %v3441_v33  ;;  %v3439_v30 = vld [vmem:[%s4502_s17 + $0x8] sm:$0xff]  ;;  %v3438_v37 = vld [vmem:[%s4502_s17] sm:$0xff] }
 0x783   : > { %v2731_v43 = vsel %vm1036_vm2, %v2730_v39, %v2711_v40  ;;  %v2736_v44 = vrot.slane %v2724_v28, 4 }
 0x784   : > { %v2735_v45 = vperm.slane %v2731_v43, %v4529_v14  ;;  %v3697_v14 = vld [vmem:[%s5049_s20] ss:$0 sm:$0xff] }
 0x785   : > { %v2737_v25 = vsel %vm1036_vm2, %v2736_v44, %v2718_v41  ;;  %2905 = vmatpush.bf16.msrb.mxu3 %v3440_v34 }
 0x786   : > { %v2741_v35 = vperm.slane %v2737_v25, %v4535_v26  ;;  %v2742_v47 = vrot.slane %v2735_v45, 4 }
 0x788   : > { %v2743_v48 = vsel %vm1036_vm2, %v2742_v47, %v2729_v46  ;;  %v2750_v49 = vrot.slane %v2741_v35, 4 }
 0x789   : > { %v2747_v50 = vperm.slane %v2743_v48, %v4535_v26  ;;  %2906 = vmatpush.bf16.msrb.mxu3 %v3439_v30  ;;  %v3701_v48 = vld [vmem:[%s954_s28] ss:$0 sm:$0xff] }
 0x78b   : > { %v2751_v51 = vsel %vm1036_vm2, %v2747_v50, %v2750_v49  ;;  %v2748_v7 = vrot.slane %v2747_v50, 4 }
 0x78c   : > { %2753 = vrot.lane.b32.xlu0 %v2751_v51, %s4114_s18 }
 0x78d   : > { %v2749_v24 = vsel %vm1036_vm2, %v2748_v7, %v2741_v35  ;;  %2907 = vmatpush.bf16.msrb.mxu3 %v3438_v37 }
 0x7fe   : > { %v2754_v36 = vpop.permute.xlu0 %2753 }
 0x7ff   : > { %v2756_v52 = vsel %vm1875_vm3, %v2749_v24, %v2754_v36 }
 0x800   : > { %v2757_v9 = vpack.c.bf16 %v2756_v52, %v2756_v52 }
 0x802   : > { %3380 = vmatmul.msk.bf16.vlgmr.msrb.gmra.mxu2 %vm1014_vm1, %v2757_v9 }
 0x885   : > { %v2785_v53 = vpop.f32.mrf.mxu2 }
 0x886   : > { %v2786_v26 = vadd.f32 %v3697_v14, %v2785_v53 }
 0x888   : > { %v2789_v55 = vadd.f32 %v3720_v54, %v2786_v26 }
 0x88a   : > { %v2790_v56 = vsel %vm1014_vm1, %v2789_v55, 0.0 }
 0x88b   : > { %2791 = vadd.xlane.f32.xlu0 %v2790_v56 }
 0x88d   : > { %v2787_v57 = vpop.f32.mrf.mxu2 }
 0x8fe   : > { %v2792_v0 = vpop.xlane.xlu0 %2791 }
 0x8ff   : > { %v2800_v1 = vmul.f32 %v4814_v29, %v2792_v0  ;;  %v3703_v0 = vld [vmem:[%s5056_s25] ss:$0 sm:$0xff] }
 0x901   : > { %v2801_v2 = vsub.f32 %v2789_v55, %v2800_v1 }
 0x903   : > { %v2802_v3 = vmul.f32 %v2801_v2, %v2801_v2 }
 0x905   : > { %v2803_v4 = vsel %vm1014_vm1, %v2802_v3, 0.0 }
 0x906   : > { %2804 = vadd.xlane.f32.xlu2 %v2803_v4 }
 0x979   : > { %v2805_v8 = vpop.xlane.xlu2 %2804 }
 0x97a   : > { %v2806_v11 = vmul.f32 %v2805_v8, %v4814_v29 }
 0x97c   : > { %v2807_v12 = vadd.f32 1e-12, %v2806_v11 }
 0x97e   : > { %3714 = vrsqrt.f32 %v2807_v12  ;;  %vm2814_vm7 = vweird.f32 %v2807_v12 }
 0x984   : > { %v3715_v13 = vpop.eup %3714 }
 0x985   : > { %v2809_v15 = vmul.f32 %v3715_v13, %v2807_v12  ;;  %vm2815_vm6 = vweird.f32 %v3715_v13 }
 0x986   : > { %vm2816_vm8 = vmor %vm2814_vm7, %vm2815_vm6 }
 0x987   : > { %v2810_v16 = vmul.f32 %v3715_v13, %v2809_v15 }
 0x989   : > { %v2811_v17 = vmul.f32 0.5, %v2810_v16 }
 0x98b   : > { %v2812_v18 = vsub.f32 1.5, %v2811_v17 }
 0x98d   : > { %v2813_v20 = vmul.f32 %v3715_v13, %v2812_v18 }
 0x98f   : > { %v2817_v22 = vsel %vm2816_vm8, %v3715_v13, %v2813_v20 }
 0x990   : > { %v2818_v23 = vmul.f32 %v2817_v22, %v2801_v2 }
 0x992   : > { %v2822_v19 = vmul.f32 %v3698_v21, %v2818_v23 }
 0x994   : > { %v2826_v31 = vadd.f32 %v3699_v27, %v2822_v19 }
 0x996   : > { %v2827_v32 = vpack.c.bf16 %v2826_v31, %v2826_v31 }
 0x998   : > { %3389 = vmatmul.msk.bf16.vlgmr.msrb.gmra.mxu0 %vm1014_vm1, %v2827_v32 }
 0xa15   : > { %v2855_v10 = vpop.f32.mrf.mxu0 }
 0xa16   : > { %v2856_v28 = vadd.f32 %v3700_v38, %v2855_v10 }
 0xa18   : > { %v2860_v39 = vmul.f32 0.044715, %v2856_v28  ;;  %v2859_v25 = vmul.f32 0.5, %v2856_v28 }
 0xa1a   : > { %v2861_v40 = vmul.f32 %v2860_v39, %v2856_v28 }
 0xa1c   : > { %v2862_v41 = vmul.f32 %v2861_v40, %v2856_v28 }
 0xa1d   : > { %v2857_v42 = vpop.f32.mrf.mxu0 }
 0xa1e   : > { %v2863_v43 = vadd.f32 %v2862_v41, %v2856_v28 }
 0xa20   : > { %v2864_v44 = vmul.f32 0.7978846, %v2863_v43 }
 0xa22   : > { %3716 = vtanh.f32 %v2864_v44 }
 0xa28   : > { %v3717_v45 = vpop.eup %3716 }
 0xa29   : > { %v2866_v46 = vadd.f32 1.0, %v3717_v45 }
 0xa2b   : > { %v2867_v35 = vmul.f32 %v2866_v46, %v2859_v25 }
 0xa2d   : > { %v2868_v47 = vpack.c.bf16 %v2867_v35, %v2867_v35 }
 0xa2f   : > { %3406 = vmatmul.msk.bf16.vlgmr.msrb.gmra.mxu3 %vm2896_vm9, %v2868_v47 }
 0xab2   : > { %v2909_v49 = vpop.f32.mrf.mxu3 }
 0xab3   : > { %v2910_v50 = vadd.f32 %v3701_v48, %v2909_v49 }
 0xab5   : > { %v2913_v51 = vadd.f32 %v2910_v50, %v2826_v31 }
 0xab7   : > { %v2914_v7 = vsel %vm1014_vm1, %v2913_v51, 0.0 }
 0xab8   : > { %2915 = vadd.xlane.f32.xlu1 %v2914_v7 }
 0xaba   : > { %v2911_v24 = vpop.f32.mrf.mxu3 }
 0xb2b   : > { %v2916_v36 = vpop.xlane.xlu1 %2915 }
 0xb2c   : > { %v2917_v52 = vmul.f32 %v2916_v36, %v4814_v29 }
 0xb2e   : > { %v2918_v9 = vsub.f32 %v2913_v51, %v2917_v52 }
 0xb30   : > { %v2919_v14 = vmul.f32 %v2918_v9, %v2918_v9 }
 0xb32   : > { %v2920_v53 = vsel %vm1014_vm1, %v2919_v14, 0.0 }
 0xb33   : > { %2921 = vadd.xlane.f32.xlu0 %v2920_v53 }
 0xba6   : > { %v2922_v26 = vpop.xlane.xlu0 %2921 }
 0xba7   : > { %v2923_v54 = vmul.f32 %v2922_v26, %v4814_v29 }
 0xba9   : > { %v2924_v55 = vadd.f32 1e-12, %v2923_v54 }
 0xbab   : > { %3718 = vrsqrt.f32 %v2924_v55  ;;  %vm2931_vm11 = vweird.f32 %v2924_v55 }
 0xbb1   : > { %v3719_v56 = vpop.eup %3718 }
 0xbb2   : > { %v2926_v57 = vmul.f32 %v3719_v56, %v2924_v55  ;;  %vm2932_vm10 = vweird.f32 %v3719_v56 }
 0xbb3   : > { %vm2933_vm12 = vmor %vm2931_vm11, %vm2932_vm10 }
 0xbb4   : > { %v2927_v58 = vmul.f32 %v3719_v56, %v2926_v57 }
 0xbb6   : > { %v2928_v59 = vmul.f32 0.5, %v2927_v58 }
 0xbb8   : > { %v2929_v60 = vsub.f32 1.5, %v2928_v59 }
 0xbba   : > { %v2930_v61 = vmul.f32 %v3719_v56, %v2929_v60 }
 0xbbc   : > { %v2934_v63 = vsel %vm2933_vm12, %v3719_v56, %v2930_v61 }
 0xbbd   : > { %v2935_v29 = vmul.f32 %v2934_v63, %v2918_v9 }
 0xbbf   : > { %v2939_v1 = vmul.f32 %v3702_v62, %v2935_v29  ;;  %2948 = sbr.rel (%p3407_p5) target bundleno = 3291 (0xcdb), region = 128 }
 0xbc1   : > { %v2943_v2 = vadd.f32 %v3703_v0, %v2939_v1 }
 0xbc3   : > { %2944 = vst.msk [vmem:[#allocation2] sm:$0xff] %vm1014_vm1, %v2943_v2 }
 0xbc4   : > { %v3443_v3 = vld [vmem:[#allocation12 + $0x8] sm:$0xff]  ;;  %v3442_v4 = vld [vmem:[#allocation12] sm:$0xff]  ;;  %v2949_v5 = vpack.c.bf16 %v2943_v2, %v2943_v2  ;;  %v3445_v6 = vld [vmem:[#allocation14 + $0x8] sm:$0xff]  ;;  %vm3018_vm13 = vcmask 253952  }
 0xbc5   : > { %2976 = vmatpush.bf16.msra.mxu0 %v3443_v3  ;;  %3011 = vmatpush.bf16.msra.mxu1 %v3445_v6  ;;  %v3444_v8 = vld [vmem:[#allocation14] sm:$0xff]  ;;  %v2954_v11 = vld [vmem:[%s5058_s15] sm:$0x1] }
 0xbc6   : > { %v2989_v18 = vld [vmem:[%s5059_s11] sm:$0x1] }
 0xbc9   : > { %2977 = vmatpush.bf16.msra.mxu0 %v3442_v4  ;;  %3012 = vmatpush.bf16.msra.mxu1 %v3444_v8 }
 0xbcc   : > { %3416 = vmatmul.msk.bf16.vlgmr.msra.gmra.mxu0 %vm1014_vm1, %v2949_v5 }
 0xc49   : > { %v2979_v12 = vpop.f32.mrf.mxu0 }
 0xc4a   : > { %v2980_v13 = vadd.f32 %v2979_v12, %v2954_v11 }
 0xc4c   : > { %3721 = vtanh.f32 %v2980_v13 }
 0xc51   : > { %v2981_v15 = vpop.f32.mrf.mxu0 }
 0xc52   : > { %v3722_v16 = vpop.eup %3721 }
 0xc53   : > { %3019 = vst.msk [vmem:[%s916_s0] sm:$0x1] %vm3018_vm13, %v3722_v16  ;;  %v2984_v17 = vpack.c.bf16 %v3722_v16, %v3722_v16 }
 0xc55   : > { %3425 = vmatmul.msk.bf16.vlgmr.msra.gmra.mxu1 %vm1014_vm1, %v2984_v17 }
 0xcd2   : > { %v3014_v20 = vpop.f32.mrf.mxu1 }
 0xcd3   : > { %v3015_v21 = vadd.f32 %v3014_v20, %v2989_v18 }
 0xcd5   : > { %3020 = vst [vmem:[%s922_s2] sm:$0x1] %v3015_v21 }
 0xcda   : > { %v3016_v22 = vpop.f32.mrf.mxu1 }
 0xcdb PF: > { %s5060_s19 = sld [smem:[#allocation29_spill]]  ;;  %s3036_s5 = sshll.u32 %s916_s0, 4  ;;  %s3037_s5 = int_to_ptr.vmem [resolvable:$true] %s3036_s5 }
 0xcdc   : > { %s5061_s13 = sld [smem:[#allocation57_spill]]  ;;  %s3022_s9 = scalar_lea.sflag [#allocation5], %s4434_s14 }
 0xcdd   : > { %s5062_s7 = sld [smem:[#allocation32_spill]] }
 0xce2   : > { %s3034_s4 = scalar_lea.hbm %s5061_s13, %s5060_s19  ;;  %s3953_s26 = scalar_lea.hbm %s5061_s13, 2 }
 0xce3   : > { %s3038_s10 = sshll.u32 %s3034_s4, 4  ;;  %p5063_p13 = scmp.ne.s32.totalorder %s5062_s7, 0  ;;  %s3039_s10 = int_to_ptr.hbm [resolvable:$true] %s3038_s10 }
 0xce4   : > { %s3947_s16 = sshra.s32 %s3039_s10, 4  ;;  %s3948_s16 = int_to_ptr.hbm [resolvable:$true] %s3947_s16 }
 0xce5   : > { %s3949_s23 = scalar_lea.hbm %s3948_s16, 1  ;;  %p3954_p4 = scmp.lt.s32.totalorder %s3948_s16, %s5061_s13 }
 0xce6   : > { %p3950_p12 = scmp.ne.s32.totalorder %s3948_s16, %s3949_s23  ;;  %p3955_p8 = scmp.lt.s32.totalorder %s3953_s26, %s3949_s23 }
 0xce8   : > { %p3951_p0 = pnand %p3950_p12, %p5063_p13  ;;  %p3956_p9 = por %p3955_p8, %p3954_p4 }
 0xcea   : > { %p3952_p2 = pneg %p3951_p0 }
 0xcec   : > { %p3957_p10 = pnand %p3956_p9, %p3952_p2 }
 0xcee   : > { %3960 = shalt.err (!%p3957_p10)
}
 0xcef   : > { %3464 = dma.vmem_to_hbm [thread:$0]  (%p5063_p13), %s3037_s5, 16, %s3039_s10, %s3022_s9  }
 0xcf0   : > { %s5064_s25 = sld [smem:[#allocation58_spill]]  ;;  %s3049_s8 = sshll.u32 %s922_s2, 4  ;;  %s3050_s8 = int_to_ptr.vmem [resolvable:$true] %s3049_s8 }
 0xcf1   : > { %s3026_s6 = scalar_lea.sflag [#allocation17], %s4434_s14 }
 0xcf6   : > { %s5065_s12 = smov %s5064_s25  ;;  %s3047_s29 = scalar_lea.hbm %s5064_s25, %s5060_s19 }
 0xcf7   : > { %s3051_s15 = sshll.u32 %s3047_s29, 4  ;;  %s3981_s4 = scalar_lea.hbm %s5065_s12, 2  ;;  %s3052_s15 = int_to_ptr.hbm [resolvable:$true] %s3051_s15 }
 0xcf8   : > { %s3975_s18 = sshra.s32 %s3052_s15, 4  ;;  %s3976_s18 = int_to_ptr.hbm [resolvable:$true] %s3975_s18 }
 0xcf9   : > { %s3977_s11 = scalar_lea.hbm %s3976_s18, 1  ;;  %p3982_p3 = scmp.lt.s32.totalorder %s3976_s18, %s5065_s12 }
 0xcfa   : > { %p3978_p11 = scmp.ne.s32.totalorder %s3976_s18, %s3977_s11  ;;  %p3983_p1 = scmp.lt.s32.totalorder %s3981_s4, %s3977_s11 }
 0xcfc   : > { %p3979_p6 = pnand %p3978_p11, %p5063_p13  ;;  %p3984_p5 = por %p3983_p1, %p3982_p3 }
 0xcfe   : > { %p3980_p7 = pneg %p3979_p6 }
 0xd00   : > { %p3985_p12 = pnand %p3984_p5, %p3980_p7 }
 0xd02   : > { %3988 = shalt.err (!%p3985_p12)
}
 0xd03   : > { %3465 = dma.vmem_to_hbm [thread:$0]  (%p5063_p13), %s3050_s8, 16, %s3052_s15, %s3026_s6  }
 0xd04 PF: > { %s5066_s14 = sld [smem:[#allocation26_spill]]  ;;  %p3503_p0 = scmp.ge.s32.totalorder %s4103_s3, 2 }
 0xd05   : > { %s5067_s2 = sld [smem:[#allocation33_spill]] }
 0xd0a   : > { %s3063_s19 = sand.u32 1, %s5066_s14  }
 0xd0b   : > { %p5068_p2 = scmp.ne.s32.totalorder %s5067_s2, 0  ;;  %s3064_s9 = scalar_lea.sflag [#allocation5], %s3063_s19 }
 0xd0d   : > { %p3492_p4 = pnand %p3503_p0, %p5068_p2 }
 0xd0f   : > { %p3493_p8 = pneg %p3492_p4 }
 0xd11   : > { %4054 = dma.done.wait (%p3493_p8), %s3064_s9, 16  }
 0xd12   : > { %4056 = vsyncadd (%p3493_p8), %s3064_s9, 4294967280  ;;  %s3073_s16 = scalar_lea.sflag [#allocation17], %s3063_s19 }
 0xd13   : > { %4058 = dma.done.wait (%p3493_p8), %s3073_s16, 16  }
 0xd14   : > { %4060 = vsyncadd (%p3493_p8), %s3073_s16, 4294967280  ;;  %s46_s3 = sadd.s32 1, %s4103_s3   ;;  %s5069_s7 = sld [smem:[#allocation25_spill]] }
 0xd15   : > { %p43_p9 = scmp.ge.s32.totalorder %s46_s3, 6   ;;  %s5070_s20 = sld [smem:[#allocation37_spill]] }
 0xd16   : > { %s5071_s23 = sld [smem:[#allocation27_spill]]  ;;  %s5077_s0 = smov %s4067_s30 }
 0xd17   : > { %s5072_s22 = sld [smem:[#allocation38_spill]]  ;;  %s5079_s21 = smov %s4079_s1 }
 0xd18   : > { %s5073_s2 = sld [smem:[#allocation30_spill]] }
 0xd19   : > { %s5074_s17 = sld [smem:[#allocation31_spill]] }
 0xd1a   : > { %s5075_s24 = sld [smem:[#allocation34_spill]]  ;;  %s5078_s30 = smov %s5069_s7 }
 0xd1b   : > { %s5076_s25 = sld [smem:[#allocation36_spill]]  ;;  %45 = sbr.rel (!%p43_p9) target bundleno = 37 (0x25), region = 245 }
 0xd1c   : > { %s5080_s1 = smov %s5071_s23 }
 0xd1f   : > { %s5081_s23 = smov %s5074_s17 }
 0xd20   :  { %3078 = vsyncpa [#allocation4], 1 }
 0xd21   :  { %3080 = vsyncpa [#allocation4 + $0x1], 1 }
 0xd22   :  { %3081 = vsyncpa [#allocation7], 1 }
 0xd23   :  { %3083 = vsyncpa [#allocation7 + $0x1], 1 }
 0xd24   :  { %3084 = vsyncpa [#allocation10], 1 }
 0xd25   :  { %3086 = vsyncpa [#allocation10 + $0x1], 1 }
 0xd26   :  { %3087 = vsyncpa [#allocation13], 1 }
 0xd27   :  { %3088 = vsyncpa [#allocation5], 1 }
 0xd28   :  { %3090 = vsyncpa [#allocation5 + $0x1], 1 }
 0xd29   :  { %3091 = vsyncpa [#allocation17], 1 }
 0xd2a   :  { %3093 = vsyncpa [#allocation17 + $0x1], 1 }

</bundles_post_ra>
